<compile_context>
chip_gen: v5e
topology: v5e:2x2
jax: 0.10.0
libtpu: 0.0.40
codegen_flags: <defaults>
</compile_context>

<pallas_src>
import jax
import jax.numpy as jnp
from jax.experimental import pallas as pl
from jax.experimental.pallas import tpu as pltpu

# ---------------- mini GPT-2 config (small, shape-consistent with the module) ----------------
B = 2            # batch
S = 8            # sequence length
H = 64           # hidden size        (768 in real GPT-2)
N_HEAD = 4       # attention heads    (12 in real GPT-2)
HEAD_DIM = H // N_HEAD
N_LAYER = 2      # transformer blocks (12 in real GPT-2)
VOCAB = 128      # len(tokenizer)     (50260 in real GPT-2 after resize)
FFN = 4 * H
LN_EPS = 1e-5
DROP_P = 0.3
M = B * S        # rows of the 2-D activation slab

NEG = -1e30
GELU_C = 0.7978845608028654  # sqrt(2/pi), for GPT-2 "gelu_new"


# ---------------- in-kernel helpers (operate on VMEM-resident values) ----------------
def _layernorm(x, g, b):
    mu = jnp.mean(x, axis=-1, keepdims=True)
    var = jnp.mean((x - mu) ** 2, axis=-1, keepdims=True)
    return (x - mu) * jax.lax.rsqrt(var + LN_EPS) * g + b


def _mm(x, w_bf16, b_f32):
    # bf16 MXU operands, f32 accumulation, f32 bias add.
    return (
        jnp.dot(x.astype(jnp.bfloat16), w_bf16, preferred_element_type=jnp.float32)
        + b_f32
    )


# ---------------- the single fused kernel (one grid step == one transformer layer) ----------------
def _gpt2_fused_kernel(
    x0_ref, mask_ref,
    ln1_g_ref, ln1_b_ref, w_qkv_ref, b_qkv_ref, w_proj_ref, b_proj_ref,
    ln2_g_ref, ln2_b_ref, w_fc_ref, b_fc_ref, w_fcp_ref, b_fcp_ref,
    lnf_g_ref, lnf_b_ref, w_cls_ref, b_cls_ref, drop_u_ref,
    o_ref, x_scr,
):
    layer = pl.program_id(0)

    # residual stream lives in VMEM scratch across the layer grid
    @pl.when(layer == 0)
    def _init():
        x_scr[...] = x0_ref[...]

    x = x_scr[...]                                            # [M, H] f32

    # ---------------- attention sub-block ----------------
    h = _layernorm(x, ln1_g_ref[0], ln1_b_ref[0])
    qkv = _mm(h, w_qkv_ref[0], b_qkv_ref[0])                  # [M, 3H] f32

    # causal + key-padding mask, generated in-kernel (no [B*NH,S,S] HBM bias array)
    rows = jax.lax.broadcasted_iota(jnp.int32, (S, S), 0)
    cols = jax.lax.broadcasted_iota(jnp.int32, (S, S), 1)
    causal = cols <= rows                                     # [S, S] bool
    scale = 1.0 / (HEAD_DIM ** 0.5)

    # in-kernel head split / merge via static slices of the VMEM-resident qkv value
    batch_rows = []
    for b in range(B):
        allowed = jnp.logical_and(causal, mask_ref[b:b + 1, :] > 0.5)   # [S, S]
        r0 = b * S
        head_cols = []
        for hh in range(N_HEAD):
            c0 = hh * HEAD_DIM
            q = qkv[r0:r0 + S, c0:c0 + HEAD_DIM].astype(jnp.bfloat16)
            k = qkv[r0:r0 + S, H + c0:H + c0 + HEAD_DIM].astype(jnp.bfloat16)
            v = qkv[r0:r0 + S, 2 * H + c0:2 * H + c0 + HEAD_DIM].astype(jnp.bfloat16)
            s = jnp.einsum("qd,kd->qk", q, k,
                           preferred_element_type=jnp.float32) * scale
            s = jnp.where(allowed, s, NEG)
            s = s - jnp.max(s, axis=-1, keepdims=True)
            p = jnp.exp(s)
            p = p / jnp.sum(p, axis=-1, keepdims=True)
            head_cols.append(
                jnp.dot(p.astype(jnp.bfloat16), v,
                        preferred_element_type=jnp.float32))            # [S, D]
        batch_rows.append(jnp.concatenate(head_cols, axis=-1))          # [S, H]
    a = jnp.concatenate(batch_rows, axis=0)                              # [M, H]

    a = _mm(a, w_proj_ref[0], b_proj_ref[0])
    x = x + a

    # ---------------- MLP sub-block ----------------
    h = _layernorm(x, ln2_g_ref[0], ln2_b_ref[0])
    h = _mm(h, w_fc_ref[0], b_fc_ref[0])
    h = 0.5 * h * (1.0 + jnp.tanh(GELU_C * (h + 0.044715 * h * h * h)))  # gelu_new
    h = _mm(h, w_fcp_ref[0], b_fcp_ref[0])
    x = x + h

    x_scr[...] = x

    # ---------------- final LN + dropout + classifier (fused, last layer only) ----------------
    @pl.when(layer == pl.num_programs(0) - 1)
    def _final():
        pooler = _layernorm(x, lnf_g_ref[...], lnf_b_ref[...])
        # F.dropout(pooler, 0.3) — training-mode dropout, as in the reference module
        keep = drop_u_ref[...] >= DROP_P
        pooler = jnp.where(keep, pooler * (1.0 / (1.0 - DROP_P)), 0.0)
        o_ref[...] = _mm(pooler, w_cls_ref[...], b_cls_ref[...])


# ---------------- pallas_call wrapper ----------------
def _stacked_spec(shape):
    # per-layer stacked parameter: stream block `l` of the leading layer axis
    zeros = (0,) * (len(shape) - 1)
    return pl.BlockSpec((1,) + tuple(shape[1:]), lambda l: (l,) + zeros)


def _shared_spec(shape):
    # layer-independent array: same (whole-array) block every grid step
    zeros = (0,) * len(shape)
    return pl.BlockSpec(tuple(shape), lambda l: zeros)


def gpt2_forward(params, input_ids, attention_masks, drop_key):
    # embedding gather + position add (plain-JAX glue)
    x0 = (params["wte"][input_ids] + params["wpe"][None, :, :]).reshape(M, H)
    mask_f = attention_masks.astype(jnp.float32)                # [B, S]
    drop_u = jax.random.uniform(drop_key, (M, H), jnp.float32)  # dropout randomness

    logits = pl.pallas_call(
        _gpt2_fused_kernel,
        out_shape=jax.ShapeDtypeStruct((M, VOCAB), jnp.float32),
        grid=(N_LAYER,),
        in_specs=[
            _shared_spec((M, H)),                  # x0 (embedded input)
            _shared_spec((B, S)),                  # attention mask
            _stacked_spec((N_LAYER, 1, H)),        # ln1_g
            _stacked_spec((N_LAYER, 1, H)),        # ln1_b
            _stacked_spec((N_LAYER, H, 3 * H)),    # w_qkv
            _stacked_spec((N_LAYER, 1, 3 * H)),    # b_qkv
            _stacked_spec((N_LAYER, H, H)),        # w_proj
            _stacked_spec((N_LAYER, 1, H)),        # b_proj
            _stacked_spec((N_LAYER, 1, H)),        # ln2_g
            _stacked_spec((N_LAYER, 1, H)),        # ln2_b
            _stacked_spec((N_LAYER, H, FFN)),      # w_fc
            _stacked_spec((N_LAYER, 1, FFN)),      # b_fc
            _stacked_spec((N_LAYER, FFN, H)),      # w_fcp
            _stacked_spec((N_LAYER, 1, H)),        # b_fcp
            _shared_spec((1, H)),                  # lnf_g
            _shared_spec((1, H)),                  # lnf_b
            _shared_spec((H, VOCAB)),              # w_cls
            _shared_spec((1, VOCAB)),              # b_cls
            _shared_spec((M, H)),                  # dropout uniforms
        ],
        out_specs=_shared_spec((M, VOCAB)),
        scratch_shapes=[pltpu.VMEM((M, H), jnp.float32)],       # residual stream
    )(
        x0, mask_f,
        params["ln1_g"], params["ln1_b"], params["w_qkv"], params["b_qkv"],
        params["w_proj"], params["b_proj"], params["ln2_g"], params["ln2_b"],
        params["w_fc"], params["b_fc"], params["w_fcp"], params["b_fcp"],
        params["lnf_g"], params["lnf_b"], params["w_cls"], params["b_cls"],
        drop_u,
    )
    return logits.reshape(B, S, VOCAB)


# ---------------- parameter init (deterministic, synthetic; weights stacked per layer) ----------------
def init_params(key):
    def nrm(k, shape, scale=0.02, dtype=jnp.float32):
        return (scale * jax.random.normal(k, shape, jnp.float32)).astype(dtype)

    k = jax.random.split(key, 7)
    return {
        "wte": nrm(k[0], (VOCAB, H)),
        "wpe": nrm(k[1], (S, H)),
        "ln1_g": jnp.ones((N_LAYER, 1, H), jnp.float32),
        "ln1_b": jnp.zeros((N_LAYER, 1, H), jnp.float32),
        "w_qkv": nrm(k[2], (N_LAYER, H, 3 * H), dtype=jnp.bfloat16),
        "b_qkv": jnp.zeros((N_LAYER, 1, 3 * H), jnp.float32),
        "w_proj": nrm(k[3], (N_LAYER, H, H), dtype=jnp.bfloat16),
        "b_proj": jnp.zeros((N_LAYER, 1, H), jnp.float32),
        "ln2_g": jnp.ones((N_LAYER, 1, H), jnp.float32),
        "ln2_b": jnp.zeros((N_LAYER, 1, H), jnp.float32),
        "w_fc": nrm(k[4], (N_LAYER, H, FFN), dtype=jnp.bfloat16),
        "b_fc": jnp.zeros((N_LAYER, 1, FFN), jnp.float32),
        "w_fcp": nrm(k[5], (N_LAYER, FFN, H), dtype=jnp.bfloat16),
        "b_fcp": jnp.zeros((N_LAYER, 1, H), jnp.float32),
        "lnf_g": jnp.ones((1, H), jnp.float32),
        "lnf_b": jnp.zeros((1, H), jnp.float32),
        "w_cls": nrm(k[6], (H, VOCAB), dtype=jnp.bfloat16),
        "b_cls": jnp.zeros((1, VOCAB), jnp.float32),
    }


if __name__ == "__main__":
    root = jax.random.PRNGKey(0)
    kp, ki, kd = jax.random.split(root, 3)
    params = init_params(kp)

    input_ids = jax.random.randint(ki, (B, S), 0, VOCAB, dtype=jnp.int32)
    attention_masks = jnp.array(
        [[1, 1, 1, 1, 1, 1, 1, 1],
         [1, 1, 1, 1, 1, 1, 0, 0]], jnp.int32)

    out = gpt2_forward(params, input_ids, attention_masks, kd)
    jax.block_until_ready(out)
    assert out.shape == (B, S, VOCAB) and out.dtype == jnp.float32
    print("KERNEL_OK")
</pallas_src>

<mosaic_0001>
module attributes {stable_mosaic.version = 11 : i64} {
  func.func @_gpt2_fused_kernel(%arg0: i32, %arg1: memref<16x64xf32, #tpu.memory_space<vmem>>, %arg2: memref<2x8xf32, #tpu.memory_space<vmem>>, %arg3: memref<1x1x64xf32, #tpu.memory_space<vmem>>, %arg4: memref<1x1x64xf32, #tpu.memory_space<vmem>>, %arg5: memref<1x64x192xbf16, #tpu.memory_space<vmem>>, %arg6: memref<1x1x192xf32, #tpu.memory_space<vmem>>, %arg7: memref<1x64x64xbf16, #tpu.memory_space<vmem>>, %arg8: memref<1x1x64xf32, #tpu.memory_space<vmem>>, %arg9: memref<1x1x64xf32, #tpu.memory_space<vmem>>, %arg10: memref<1x1x64xf32, #tpu.memory_space<vmem>>, %arg11: memref<1x64x256xbf16, #tpu.memory_space<vmem>>, %arg12: memref<1x1x256xf32, #tpu.memory_space<vmem>>, %arg13: memref<1x256x64xbf16, #tpu.memory_space<vmem>>, %arg14: memref<1x1x64xf32, #tpu.memory_space<vmem>>, %arg15: memref<1x64xf32, #tpu.memory_space<vmem>>, %arg16: memref<1x64xf32, #tpu.memory_space<vmem>>, %arg17: memref<64x128xbf16, #tpu.memory_space<vmem>>, %arg18: memref<1x128xf32, #tpu.memory_space<vmem>>, %arg19: memref<16x64xf32, #tpu.memory_space<vmem>>, %arg20: memref<16x128xf32, #tpu.memory_space<vmem>>, %arg21: memref<16x64xf32, #tpu.memory_space<vmem>>) attributes {dimension_semantics = [#tpu.dimension_semantics<arbitrary>], iteration_bounds = array<i64: 2>, scalar_prefetch = 0 : i64, scratch_operands = 1 : i64, tpu.core_type = #tpu.core_type<tc>, window_params = [{pipeline_mode = #tpu.pipeline_mode<synchronous>, transform_indices = @transform_0, window_bounds = array<i64: 16, 64>}, {pipeline_mode = #tpu.pipeline_mode<synchronous>, transform_indices = @transform_1, window_bounds = array<i64: 2, 8>}, {transform_indices = @transform_2, window_bounds = array<i64: 1, 1, 64>}, {transform_indices = @transform_3, window_bounds = array<i64: 1, 1, 64>}, {transform_indices = @transform_4, window_bounds = array<i64: 1, 64, 192>}, {transform_indices = @transform_5, window_bounds = array<i64: 1, 1, 192>}, {transform_indices = @transform_6, window_bounds = array<i64: 1, 64, 64>}, {transform_indices = @transform_7, window_bounds = array<i64: 1, 1, 64>}, {transform_indices = @transform_8, window_bounds = array<i64: 1, 1, 64>}, {transform_indices = @transform_9, window_bounds = array<i64: 1, 1, 64>}, {transform_indices = @transform_10, window_bounds = array<i64: 1, 64, 256>}, {transform_indices = @transform_11, window_bounds = array<i64: 1, 1, 256>}, {transform_indices = @transform_12, window_bounds = array<i64: 1, 256, 64>}, {transform_indices = @transform_13, window_bounds = array<i64: 1, 1, 64>}, {pipeline_mode = #tpu.pipeline_mode<synchronous>, transform_indices = @transform_14, window_bounds = array<i64: 1, 64>}, {pipeline_mode = #tpu.pipeline_mode<synchronous>, transform_indices = @transform_15, window_bounds = array<i64: 1, 64>}, {pipeline_mode = #tpu.pipeline_mode<synchronous>, transform_indices = @transform_16, window_bounds = array<i64: 64, 128>}, {pipeline_mode = #tpu.pipeline_mode<synchronous>, transform_indices = @transform_17, window_bounds = array<i64: 1, 128>}, {pipeline_mode = #tpu.pipeline_mode<synchronous>, transform_indices = @transform_18, window_bounds = array<i64: 16, 64>}, {pipeline_mode = #tpu.pipeline_mode<synchronous>, transform_indices = @transform_19, window_bounds = array<i64: 16, 128>}]} {
    %c0_i32 = arith.constant 0 : i32
    %0 = arith.cmpi eq, %arg0, %c0_i32 : i32
    %1 = arith.extui %0 : i1 to i32
    %c0_i32_0 = arith.constant 0 : i32
    %2 = arith.cmpi ne, %1, %c0_i32_0 : i32
    scf.if %2 {
      %c0_111 = arith.constant 0 : index
      %c0_112 = arith.constant 0 : index
      %299 = vector.load %arg1[%c0_111, %c0_112] : memref<16x64xf32, #tpu.memory_space<vmem>>, vector<16x64xf32>
      %c0_113 = arith.constant 0 : index
      %c0_114 = arith.constant 0 : index
      %300 = vector.load %arg21[%c0_113, %c0_114] : memref<16x64xf32, #tpu.memory_space<vmem>>, vector<16x64xf32>
      tpu.vector_store %arg21[%c0_113, %c0_114], %299 {strides = array<i32>} : memref<16x64xf32, #tpu.memory_space<vmem>>, vector<16x64xf32>,
    } else {
    }
    %c0 = arith.constant 0 : index
    %c0_1 = arith.constant 0 : index
    %3 = vector.load %arg21[%c0, %c0_1] : memref<16x64xf32, #tpu.memory_space<vmem>>, vector<16x64xf32>
    %c0_2 = arith.constant 0 : index
    %c0_3 = arith.constant 0 : index
    %c0_4 = arith.constant 0 : index
    %4 = vector.load %arg3[%c0_2, %c0_3, %c0_4] : memref<1x1x64xf32, #tpu.memory_space<vmem>>, vector<1x1x64xf32>
    %5 = vector.shape_cast %4 : vector<1x1x64xf32> to vector<1x64xf32>
    %c0_5 = arith.constant 0 : index
    %c0_6 = arith.constant 0 : index
    %c0_7 = arith.constant 0 : index
    %6 = vector.load %arg4[%c0_5, %c0_6, %c0_7] : memref<1x1x64xf32, #tpu.memory_space<vmem>>, vector<1x1x64xf32>
    %7 = vector.shape_cast %6 : vector<1x1x64xf32> to vector<1x64xf32>
    %cst = arith.constant dense<0.000000e+00> : vector<16xf32>
    %8 = vector.multi_reduction <add>, %3, %cst [1] : vector<16x64xf32> to vector<16xf32>
    %9 = vector.shape_cast %8 : vector<16xf32> to vector<16x1xf32>
    %cst_8 = arith.constant 6.400000e+01 : f32
    %10 = vector.broadcast %cst_8 : f32 to vector<16x1xf32>
    %11 = arith.divf %9, %10 : vector<16x1xf32>
    %12 = vector.broadcast %11 : vector<16x1xf32> to vector<16x64xf32>
    %13 = arith.subf %3, %12 : vector<16x64xf32>
    %14 = arith.mulf %13, %13 : vector<16x64xf32>
    %cst_9 = arith.constant dense<0.000000e+00> : vector<16xf32>
    %15 = vector.multi_reduction <add>, %14, %cst_9 [1] : vector<16x64xf32> to vector<16xf32>
    %16 = vector.shape_cast %15 : vector<16xf32> to vector<16x1xf32>
    %cst_10 = arith.constant 6.400000e+01 : f32
    %17 = vector.broadcast %cst_10 : f32 to vector<16x1xf32>
    %18 = arith.divf %16, %17 : vector<16x1xf32>
    %19 = vector.broadcast %11 : vector<16x1xf32> to vector<16x64xf32>
    %20 = arith.subf %3, %19 : vector<16x64xf32>
    %cst_11 = arith.constant 9.99999974E-6 : f32
    %21 = vector.broadcast %cst_11 : f32 to vector<16x1xf32>
    %22 = arith.addf %18, %21 : vector<16x1xf32>
    %23 = math.rsqrt %22 : vector<16x1xf32>
    %24 = vector.broadcast %23 : vector<16x1xf32> to vector<16x64xf32>
    %25 = arith.mulf %20, %24 : vector<16x64xf32>
    %26 = vector.broadcast %5 : vector<1x64xf32> to vector<16x64xf32>
    %27 = arith.mulf %25, %26 : vector<16x64xf32>
    %28 = vector.broadcast %7 : vector<1x64xf32> to vector<16x64xf32>
    %29 = arith.addf %27, %28 : vector<16x64xf32>
    %c0_12 = arith.constant 0 : index
    %c0_13 = arith.constant 0 : index
    %c0_14 = arith.constant 0 : index
    %30 = vector.load %arg5[%c0_12, %c0_13, %c0_14] : memref<1x64x192xbf16, #tpu.memory_space<vmem>>, vector<1x64x192xbf16>
    %31 = vector.shape_cast %30 : vector<1x64x192xbf16> to vector<64x192xbf16>
    %c0_15 = arith.constant 0 : index
    %c0_16 = arith.constant 0 : index
    %c0_17 = arith.constant 0 : index
    %32 = vector.load %arg6[%c0_15, %c0_16, %c0_17] : memref<1x1x192xf32, #tpu.memory_space<vmem>>, vector<1x1x192xf32>
    %33 = vector.shape_cast %32 : vector<1x1x192xf32> to vector<1x192xf32>
    %34 = arith.truncf %29 : vector<16x64xf32> to vector<16x64xbf16>
    %cst_18 = arith.constant dense<0.000000e+00> : vector<16x192xf32>
    %35 = tpu.matmul %34, %31, %cst_18 {dimension_numbers = #tpu.dot_dimension_numbers<[1], [0], [0], [1], [0, 0, 1, 1], [], []>} : vector<16x64xbf16>, vector<64x192xbf16>, vector<16x192xf32> -> vector<16x192xf32>
    %36 = vector.broadcast %33 : vector<1x192xf32> to vector<16x192xf32>
    %37 = arith.addf %35, %36 : vector<16x192xf32>
    %38 = tpu.iota {dimensions = array<i32: 0>} : vector<8x8xi32>
    %39 = tpu.iota {dimensions = array<i32: 1>} : vector<8x8xi32>
    %40 = arith.cmpi sle, %39, %38 : vector<8x8xi32>
    %c0_19 = arith.constant 0 : index
    %c0_20 = arith.constant 0 : index
    %41 = vector.load %arg2[%c0_19, %c0_20] : memref<2x8xf32, #tpu.memory_space<vmem>>, vector<1x8xf32>
    %cst_21 = arith.constant 5.000000e-01 : f32
    %42 = vector.broadcast %cst_21 : f32 to vector<1x8xf32>
    %43 = arith.cmpf ogt, %41, %42 : vector<1x8xf32>
    %44 = vector.broadcast %43 : vector<1x8xi1> to vector<8x8xi1>
    %45 = arith.andi %40, %44 : vector<8x8xi1>
    %46 = vector.extract_strided_slice %37 {offsets = [0, 0], sizes = [8, 16], strides = [1, 1]} : vector<16x192xf32> to vector<8x16xf32>
    %47 = arith.truncf %46 : vector<8x16xf32> to vector<8x16xbf16>
    %48 = vector.extract_strided_slice %37 {offsets = [0, 64], sizes = [8, 16], strides = [1, 1]} : vector<16x192xf32> to vector<8x16xf32>
    %49 = arith.truncf %48 : vector<8x16xf32> to vector<8x16xbf16>
    %50 = vector.extract_strided_slice %37 {offsets = [0, 128], sizes = [8, 16], strides = [1, 1]} : vector<16x192xf32> to vector<8x16xf32>
    %51 = arith.truncf %50 : vector<8x16xf32> to vector<8x16xbf16>
    "tpu.trace_start"() <{level = 10 : i32, message = "qd,kd->qk"}> : () -> ()
    %cst_22 = arith.constant dense<0.000000e+00> : vector<8x8xf32>
    %52 = tpu.matmul %47, %49, %cst_22 {dimension_numbers = #tpu.dot_dimension_numbers<[1], [1], [0], [0], [0, 0, 1, 0], [], []>} : vector<8x16xbf16>, vector<8x16xbf16>, vector<8x8xf32> -> vector<8x8xf32>
    "tpu.trace_stop"() : () -> ()
    %cst_23 = arith.constant 2.500000e-01 : f32
    %53 = vector.broadcast %cst_23 : f32 to vector<8x8xf32>
    %54 = arith.mulf %52, %53 : vector<8x8xf32>
    %cst_24 = arith.constant -1.000000e+30 : f32
    %55 = vector.broadcast %cst_24 : f32 to vector<8x8xf32>
    %56 = arith.select %45, %54, %55 : vector<8x8xi1>, vector<8x8xf32>
    %cst_25 = arith.constant dense<0xFF800000> : vector<8xf32>
    %57 = vector.multi_reduction <maximumf>, %56, %cst_25 [1] : vector<8x8xf32> to vector<8xf32>
    %58 = vector.shape_cast %57 : vector<8xf32> to vector<8x1xf32>
    %59 = vector.broadcast %58 : vector<8x1xf32> to vector<8x8xf32>
    %60 = arith.subf %56, %59 : vector<8x8xf32>
    %61 = math.exp %60 : vector<8x8xf32>
    %cst_26 = arith.constant dense<0.000000e+00> : vector<8xf32>
    %62 = vector.multi_reduction <add>, %61, %cst_26 [1] : vector<8x8xf32> to vector<8xf32>
    %63 = vector.shape_cast %62 : vector<8xf32> to vector<8x1xf32>
    %64 = vector.broadcast %63 : vector<8x1xf32> to vector<8x8xf32>
    %65 = arith.divf %61, %64 : vector<8x8xf32>
    %66 = arith.truncf %65 : vector<8x8xf32> to vector<8x8xbf16>
    %cst_27 = arith.constant dense<0.000000e+00> : vector<8x16xf32>
    %67 = tpu.matmul %66, %51, %cst_27 {dimension_numbers = #tpu.dot_dimension_numbers<[1], [0], [0], [1], [0, 0, 1, 1], [], []>} : vector<8x8xbf16>, vector<8x16xbf16>, vector<8x16xf32> -> vector<8x16xf32>
    %68 = vector.extract_strided_slice %37 {offsets = [0, 16], sizes = [8, 16], strides = [1, 1]} : vector<16x192xf32> to vector<8x16xf32>
    %69 = arith.truncf %68 : vector<8x16xf32> to vector<8x16xbf16>
    %70 = vector.extract_strided_slice %37 {offsets = [0, 80], sizes = [8, 16], strides = [1, 1]} : vector<16x192xf32> to vector<8x16xf32>
    %71 = arith.truncf %70 : vector<8x16xf32> to vector<8x16xbf16>
    %72 = vector.extract_strided_slice %37 {offsets = [0, 144], sizes = [8, 16], strides = [1, 1]} : vector<16x192xf32> to vector<8x16xf32>
    %73 = arith.truncf %72 : vector<8x16xf32> to vector<8x16xbf16>
    "tpu.trace_start"() <{level = 10 : i32, message = "qd,kd->qk"}> : () -> ()
    %cst_28 = arith.constant dense<0.000000e+00> : vector<8x8xf32>
    %74 = tpu.matmul %69, %71, %cst_28 {dimension_numbers = #tpu.dot_dimension_numbers<[1], [1], [0], [0], [0, 0, 1, 0], [], []>} : vector<8x16xbf16>, vector<8x16xbf16>, vector<8x8xf32> -> vector<8x8xf32>
    "tpu.trace_stop"() : () -> ()
    %cst_29 = arith.constant 2.500000e-01 : f32
    %75 = vector.broadcast %cst_29 : f32 to vector<8x8xf32>
    %76 = arith.mulf %74, %75 : vector<8x8xf32>
    %cst_30 = arith.constant -1.000000e+30 : f32
    %77 = vector.broadcast %cst_30 : f32 to vector<8x8xf32>
    %78 = arith.select %45, %76, %77 : vector<8x8xi1>, vector<8x8xf32>
    %cst_31 = arith.constant dense<0xFF800000> : vector<8xf32>
    %79 = vector.multi_reduction <maximumf>, %78, %cst_31 [1] : vector<8x8xf32> to vector<8xf32>
    %80 = vector.shape_cast %79 : vector<8xf32> to vector<8x1xf32>
    %81 = vector.broadcast %80 : vector<8x1xf32> to vector<8x8xf32>
    %82 = arith.subf %78, %81 : vector<8x8xf32>
    %83 = math.exp %82 : vector<8x8xf32>
    %cst_32 = arith.constant dense<0.000000e+00> : vector<8xf32>
    %84 = vector.multi_reduction <add>, %83, %cst_32 [1] : vector<8x8xf32> to vector<8xf32>
    %85 = vector.shape_cast %84 : vector<8xf32> to vector<8x1xf32>
    %86 = vector.broadcast %85 : vector<8x1xf32> to vector<8x8xf32>
    %87 = arith.divf %83, %86 : vector<8x8xf32>
    %88 = arith.truncf %87 : vector<8x8xf32> to vector<8x8xbf16>
    %cst_33 = arith.constant dense<0.000000e+00> : vector<8x16xf32>
    %89 = tpu.matmul %88, %73, %cst_33 {dimension_numbers = #tpu.dot_dimension_numbers<[1], [0], [0], [1], [0, 0, 1, 1], [], []>} : vector<8x8xbf16>, vector<8x16xbf16>, vector<8x16xf32> -> vector<8x16xf32>
    %90 = vector.extract_strided_slice %37 {offsets = [0, 32], sizes = [8, 16], strides = [1, 1]} : vector<16x192xf32> to vector<8x16xf32>
    %91 = arith.truncf %90 : vector<8x16xf32> to vector<8x16xbf16>
    %92 = vector.extract_strided_slice %37 {offsets = [0, 96], sizes = [8, 16], strides = [1, 1]} : vector<16x192xf32> to vector<8x16xf32>
    %93 = arith.truncf %92 : vector<8x16xf32> to vector<8x16xbf16>
    %94 = vector.extract_strided_slice %37 {offsets = [0, 160], sizes = [8, 16], strides = [1, 1]} : vector<16x192xf32> to vector<8x16xf32>
    %95 = arith.truncf %94 : vector<8x16xf32> to vector<8x16xbf16>
    "tpu.trace_start"() <{level = 10 : i32, message = "qd,kd->qk"}> : () -> ()
    %cst_34 = arith.constant dense<0.000000e+00> : vector<8x8xf32>
    %96 = tpu.matmul %91, %93, %cst_34 {dimension_numbers = #tpu.dot_dimension_numbers<[1], [1], [0], [0], [0, 0, 1, 0], [], []>} : vector<8x16xbf16>, vector<8x16xbf16>, vector<8x8xf32> -> vector<8x8xf32>
    "tpu.trace_stop"() : () -> ()
    %cst_35 = arith.constant 2.500000e-01 : f32
    %97 = vector.broadcast %cst_35 : f32 to vector<8x8xf32>
    %98 = arith.mulf %96, %97 : vector<8x8xf32>
    %cst_36 = arith.constant -1.000000e+30 : f32
    %99 = vector.broadcast %cst_36 : f32 to vector<8x8xf32>
    %100 = arith.select %45, %98, %99 : vector<8x8xi1>, vector<8x8xf32>
    %cst_37 = arith.constant dense<0xFF800000> : vector<8xf32>
    %101 = vector.multi_reduction <maximumf>, %100, %cst_37 [1] : vector<8x8xf32> to vector<8xf32>
    %102 = vector.shape_cast %101 : vector<8xf32> to vector<8x1xf32>
    %103 = vector.broadcast %102 : vector<8x1xf32> to vector<8x8xf32>
    %104 = arith.subf %100, %103 : vector<8x8xf32>
    %105 = math.exp %104 : vector<8x8xf32>
    %cst_38 = arith.constant dense<0.000000e+00> : vector<8xf32>
    %106 = vector.multi_reduction <add>, %105, %cst_38 [1] : vector<8x8xf32> to vector<8xf32>
    %107 = vector.shape_cast %106 : vector<8xf32> to vector<8x1xf32>
    %108 = vector.broadcast %107 : vector<8x1xf32> to vector<8x8xf32>
    %109 = arith.divf %105, %108 : vector<8x8xf32>
    %110 = arith.truncf %109 : vector<8x8xf32> to vector<8x8xbf16>
    %cst_39 = arith.constant dense<0.000000e+00> : vector<8x16xf32>
    %111 = tpu.matmul %110, %95, %cst_39 {dimension_numbers = #tpu.dot_dimension_numbers<[1], [0], [0], [1], [0, 0, 1, 1], [], []>} : vector<8x8xbf16>, vector<8x16xbf16>, vector<8x16xf32> -> vector<8x16xf32>
    %112 = vector.extract_strided_slice %37 {offsets = [0, 48], sizes = [8, 16], strides = [1, 1]} : vector<16x192xf32> to vector<8x16xf32>
    %113 = arith.truncf %112 : vector<8x16xf32> to vector<8x16xbf16>
    %114 = vector.extract_strided_slice %37 {offsets = [0, 112], sizes = [8, 16], strides = [1, 1]} : vector<16x192xf32> to vector<8x16xf32>
    %115 = arith.truncf %114 : vector<8x16xf32> to vector<8x16xbf16>
    %116 = vector.extract_strided_slice %37 {offsets = [0, 176], sizes = [8, 16], strides = [1, 1]} : vector<16x192xf32> to vector<8x16xf32>
    %117 = arith.truncf %116 : vector<8x16xf32> to vector<8x16xbf16>
    "tpu.trace_start"() <{level = 10 : i32, message = "qd,kd->qk"}> : () -> ()
    %cst_40 = arith.constant dense<0.000000e+00> : vector<8x8xf32>
    %118 = tpu.matmul %113, %115, %cst_40 {dimension_numbers = #tpu.dot_dimension_numbers<[1], [1], [0], [0], [0, 0, 1, 0], [], []>} : vector<8x16xbf16>, vector<8x16xbf16>, vector<8x8xf32> -> vector<8x8xf32>
    "tpu.trace_stop"() : () -> ()
    %cst_41 = arith.constant 2.500000e-01 : f32
    %119 = vector.broadcast %cst_41 : f32 to vector<8x8xf32>
    %120 = arith.mulf %118, %119 : vector<8x8xf32>
    %cst_42 = arith.constant -1.000000e+30 : f32
    %121 = vector.broadcast %cst_42 : f32 to vector<8x8xf32>
    %122 = arith.select %45, %120, %121 : vector<8x8xi1>, vector<8x8xf32>
    %cst_43 = arith.constant dense<0xFF800000> : vector<8xf32>
    %123 = vector.multi_reduction <maximumf>, %122, %cst_43 [1] : vector<8x8xf32> to vector<8xf32>
    %124 = vector.shape_cast %123 : vector<8xf32> to vector<8x1xf32>
    %125 = vector.broadcast %124 : vector<8x1xf32> to vector<8x8xf32>
    %126 = arith.subf %122, %125 : vector<8x8xf32>
    %127 = math.exp %126 : vector<8x8xf32>
    %cst_44 = arith.constant dense<0.000000e+00> : vector<8xf32>
    %128 = vector.multi_reduction <add>, %127, %cst_44 [1] : vector<8x8xf32> to vector<8xf32>
    %129 = vector.shape_cast %128 : vector<8xf32> to vector<8x1xf32>
    %130 = vector.broadcast %129 : vector<8x1xf32> to vector<8x8xf32>
    %131 = arith.divf %127, %130 : vector<8x8xf32>
    %132 = arith.truncf %131 : vector<8x8xf32> to vector<8x8xbf16>
    %cst_45 = arith.constant dense<0.000000e+00> : vector<8x16xf32>
    %133 = tpu.matmul %132, %117, %cst_45 {dimension_numbers = #tpu.dot_dimension_numbers<[1], [0], [0], [1], [0, 0, 1, 1], [], []>} : vector<8x8xbf16>, vector<8x16xbf16>, vector<8x16xf32> -> vector<8x16xf32>
    %134 = tpu.concatenate %67, %89, %111, %133 in 1 : vector<8x16xf32>, vector<8x16xf32>, vector<8x16xf32>, vector<8x16xf32> -> vector<8x64xf32>
    %c1 = arith.constant 1 : index
    %c0_46 = arith.constant 0 : index
    %135 = vector.load %arg2[%c1, %c0_46] : memref<2x8xf32, #tpu.memory_space<vmem>>, vector<1x8xf32>
    %cst_47 = arith.constant 5.000000e-01 : f32
    %136 = vector.broadcast %cst_47 : f32 to vector<1x8xf32>
    %137 = arith.cmpf ogt, %135, %136 : vector<1x8xf32>
    %138 = vector.broadcast %137 : vector<1x8xi1> to vector<8x8xi1>
    %139 = arith.andi %40, %138 : vector<8x8xi1>
    %140 = vector.extract_strided_slice %37 {offsets = [8, 0], sizes = [8, 16], strides = [1, 1]} : vector<16x192xf32> to vector<8x16xf32>
    %141 = arith.truncf %140 : vector<8x16xf32> to vector<8x16xbf16>
    %142 = vector.extract_strided_slice %37 {offsets = [8, 64], sizes = [8, 16], strides = [1, 1]} : vector<16x192xf32> to vector<8x16xf32>
    %143 = arith.truncf %142 : vector<8x16xf32> to vector<8x16xbf16>
    %144 = vector.extract_strided_slice %37 {offsets = [8, 128], sizes = [8, 16], strides = [1, 1]} : vector<16x192xf32> to vector<8x16xf32>
    %145 = arith.truncf %144 : vector<8x16xf32> to vector<8x16xbf16>
    "tpu.trace_start"() <{level = 10 : i32, message = "qd,kd->qk"}> : () -> ()
    %cst_48 = arith.constant dense<0.000000e+00> : vector<8x8xf32>
    %146 = tpu.matmul %141, %143, %cst_48 {dimension_numbers = #tpu.dot_dimension_numbers<[1], [1], [0], [0], [0, 0, 1, 0], [], []>} : vector<8x16xbf16>, vector<8x16xbf16>, vector<8x8xf32> -> vector<8x8xf32>
    "tpu.trace_stop"() : () -> ()
    %cst_49 = arith.constant 2.500000e-01 : f32
    %147 = vector.broadcast %cst_49 : f32 to vector<8x8xf32>
    %148 = arith.mulf %146, %147 : vector<8x8xf32>
    %cst_50 = arith.constant -1.000000e+30 : f32
    %149 = vector.broadcast %cst_50 : f32 to vector<8x8xf32>
    %150 = arith.select %139, %148, %149 : vector<8x8xi1>, vector<8x8xf32>
    %cst_51 = arith.constant dense<0xFF800000> : vector<8xf32>
    %151 = vector.multi_reduction <maximumf>, %150, %cst_51 [1] : vector<8x8xf32> to vector<8xf32>
    %152 = vector.shape_cast %151 : vector<8xf32> to vector<8x1xf32>
    %153 = vector.broadcast %152 : vector<8x1xf32> to vector<8x8xf32>
    %154 = arith.subf %150, %153 : vector<8x8xf32>
    %155 = math.exp %154 : vector<8x8xf32>
    %cst_52 = arith.constant dense<0.000000e+00> : vector<8xf32>
    %156 = vector.multi_reduction <add>, %155, %cst_52 [1] : vector<8x8xf32> to vector<8xf32>
    %157 = vector.shape_cast %156 : vector<8xf32> to vector<8x1xf32>
    %158 = vector.broadcast %157 : vector<8x1xf32> to vector<8x8xf32>
    %159 = arith.divf %155, %158 : vector<8x8xf32>
    %160 = arith.truncf %159 : vector<8x8xf32> to vector<8x8xbf16>
    %cst_53 = arith.constant dense<0.000000e+00> : vector<8x16xf32>
    %161 = tpu.matmul %160, %145, %cst_53 {dimension_numbers = #tpu.dot_dimension_numbers<[1], [0], [0], [1], [0, 0, 1, 1], [], []>} : vector<8x8xbf16>, vector<8x16xbf16>, vector<8x16xf32> -> vector<8x16xf32>
    %162 = vector.extract_strided_slice %37 {offsets = [8, 16], sizes = [8, 16], strides = [1, 1]} : vector<16x192xf32> to vector<8x16xf32>
    %163 = arith.truncf %162 : vector<8x16xf32> to vector<8x16xbf16>
    %164 = vector.extract_strided_slice %37 {offsets = [8, 80], sizes = [8, 16], strides = [1, 1]} : vector<16x192xf32> to vector<8x16xf32>
    %165 = arith.truncf %164 : vector<8x16xf32> to vector<8x16xbf16>
    %166 = vector.extract_strided_slice %37 {offsets = [8, 144], sizes = [8, 16], strides = [1, 1]} : vector<16x192xf32> to vector<8x16xf32>
    %167 = arith.truncf %166 : vector<8x16xf32> to vector<8x16xbf16>
    "tpu.trace_start"() <{level = 10 : i32, message = "qd,kd->qk"}> : () -> ()
    %cst_54 = arith.constant dense<0.000000e+00> : vector<8x8xf32>
    %168 = tpu.matmul %163, %165, %cst_54 {dimension_numbers = #tpu.dot_dimension_numbers<[1], [1], [0], [0], [0, 0, 1, 0], [], []>} : vector<8x16xbf16>, vector<8x16xbf16>, vector<8x8xf32> -> vector<8x8xf32>
    "tpu.trace_stop"() : () -> ()
    %cst_55 = arith.constant 2.500000e-01 : f32
    %169 = vector.broadcast %cst_55 : f32 to vector<8x8xf32>
    %170 = arith.mulf %168, %169 : vector<8x8xf32>
    %cst_56 = arith.constant -1.000000e+30 : f32
    %171 = vector.broadcast %cst_56 : f32 to vector<8x8xf32>
    %172 = arith.select %139, %170, %171 : vector<8x8xi1>, vector<8x8xf32>
    %cst_57 = arith.constant dense<0xFF800000> : vector<8xf32>
    %173 = vector.multi_reduction <maximumf>, %172, %cst_57 [1] : vector<8x8xf32> to vector<8xf32>
    %174 = vector.shape_cast %173 : vector<8xf32> to vector<8x1xf32>
    %175 = vector.broadcast %174 : vector<8x1xf32> to vector<8x8xf32>
    %176 = arith.subf %172, %175 : vector<8x8xf32>
    %177 = math.exp %176 : vector<8x8xf32>
    %cst_58 = arith.constant dense<0.000000e+00> : vector<8xf32>
    %178 = vector.multi_reduction <add>, %177, %cst_58 [1] : vector<8x8xf32> to vector<8xf32>
    %179 = vector.shape_cast %178 : vector<8xf32> to vector<8x1xf32>
    %180 = vector.broadcast %179 : vector<8x1xf32> to vector<8x8xf32>
    %181 = arith.divf %177, %180 : vector<8x8xf32>
    %182 = arith.truncf %181 : vector<8x8xf32> to vector<8x8xbf16>
    %cst_59 = arith.constant dense<0.000000e+00> : vector<8x16xf32>
    %183 = tpu.matmul %182, %167, %cst_59 {dimension_numbers = #tpu.dot_dimension_numbers<[1], [0], [0], [1], [0, 0, 1, 1], [], []>} : vector<8x8xbf16>, vector<8x16xbf16>, vector<8x16xf32> -> vector<8x16xf32>
    %184 = vector.extract_strided_slice %37 {offsets = [8, 32], sizes = [8, 16], strides = [1, 1]} : vector<16x192xf32> to vector<8x16xf32>
    %185 = arith.truncf %184 : vector<8x16xf32> to vector<8x16xbf16>
    %186 = vector.extract_strided_slice %37 {offsets = [8, 96], sizes = [8, 16], strides = [1, 1]} : vector<16x192xf32> to vector<8x16xf32>
    %187 = arith.truncf %186 : vector<8x16xf32> to vector<8x16xbf16>
    %188 = vector.extract_strided_slice %37 {offsets = [8, 160], sizes = [8, 16], strides = [1, 1]} : vector<16x192xf32> to vector<8x16xf32>
    %189 = arith.truncf %188 : vector<8x16xf32> to vector<8x16xbf16>
    "tpu.trace_start"() <{level = 10 : i32, message = "qd,kd->qk"}> : () -> ()
    %cst_60 = arith.constant dense<0.000000e+00> : vector<8x8xf32>
    %190 = tpu.matmul %185, %187, %cst_60 {dimension_numbers = #tpu.dot_dimension_numbers<[1], [1], [0], [0], [0, 0, 1, 0], [], []>} : vector<8x16xbf16>, vector<8x16xbf16>, vector<8x8xf32> -> vector<8x8xf32>
    "tpu.trace_stop"() : () -> ()
    %cst_61 = arith.constant 2.500000e-01 : f32
    %191 = vector.broadcast %cst_61 : f32 to vector<8x8xf32>
    %192 = arith.mulf %190, %191 : vector<8x8xf32>
    %cst_62 = arith.constant -1.000000e+30 : f32
    %193 = vector.broadcast %cst_62 : f32 to vector<8x8xf32>
    %194 = arith.select %139, %192, %193 : vector<8x8xi1>, vector<8x8xf32>
    %cst_63 = arith.constant dense<0xFF800000> : vector<8xf32>
    %195 = vector.multi_reduction <maximumf>, %194, %cst_63 [1] : vector<8x8xf32> to vector<8xf32>
    %196 = vector.shape_cast %195 : vector<8xf32> to vector<8x1xf32>
    %197 = vector.broadcast %196 : vector<8x1xf32> to vector<8x8xf32>
    %198 = arith.subf %194, %197 : vector<8x8xf32>
    %199 = math.exp %198 : vector<8x8xf32>
    %cst_64 = arith.constant dense<0.000000e+00> : vector<8xf32>
    %200 = vector.multi_reduction <add>, %199, %cst_64 [1] : vector<8x8xf32> to vector<8xf32>
    %201 = vector.shape_cast %200 : vector<8xf32> to vector<8x1xf32>
    %202 = vector.broadcast %201 : vector<8x1xf32> to vector<8x8xf32>
    %203 = arith.divf %199, %202 : vector<8x8xf32>
    %204 = arith.truncf %203 : vector<8x8xf32> to vector<8x8xbf16>
    %cst_65 = arith.constant dense<0.000000e+00> : vector<8x16xf32>
    %205 = tpu.matmul %204, %189, %cst_65 {dimension_numbers = #tpu.dot_dimension_numbers<[1], [0], [0], [1], [0, 0, 1, 1], [], []>} : vector<8x8xbf16>, vector<8x16xbf16>, vector<8x16xf32> -> vector<8x16xf32>
    %206 = vector.extract_strided_slice %37 {offsets = [8, 48], sizes = [8, 16], strides = [1, 1]} : vector<16x192xf32> to vector<8x16xf32>
    %207 = arith.truncf %206 : vector<8x16xf32> to vector<8x16xbf16>
    %208 = vector.extract_strided_slice %37 {offsets = [8, 112], sizes = [8, 16], strides = [1, 1]} : vector<16x192xf32> to vector<8x16xf32>
    %209 = arith.truncf %208 : vector<8x16xf32> to vector<8x16xbf16>
    %210 = vector.extract_strided_slice %37 {offsets = [8, 176], sizes = [8, 16], strides = [1, 1]} : vector<16x192xf32> to vector<8x16xf32>
    %211 = arith.truncf %210 : vector<8x16xf32> to vector<8x16xbf16>
    "tpu.trace_start"() <{level = 10 : i32, message = "qd,kd->qk"}> : () -> ()
    %cst_66 = arith.constant dense<0.000000e+00> : vector<8x8xf32>
    %212 = tpu.matmul %207, %209, %cst_66 {dimension_numbers = #tpu.dot_dimension_numbers<[1], [1], [0], [0], [0, 0, 1, 0], [], []>} : vector<8x16xbf16>, vector<8x16xbf16>, vector<8x8xf32> -> vector<8x8xf32>
    "tpu.trace_stop"() : () -> ()
    %cst_67 = arith.constant 2.500000e-01 : f32
    %213 = vector.broadcast %cst_67 : f32 to vector<8x8xf32>
    %214 = arith.mulf %212, %213 : vector<8x8xf32>
    %cst_68 = arith.constant -1.000000e+30 : f32
    %215 = vector.broadcast %cst_68 : f32 to vector<8x8xf32>
    %216 = arith.select %139, %214, %215 : vector<8x8xi1>, vector<8x8xf32>
    %cst_69 = arith.constant dense<0xFF800000> : vector<8xf32>
    %217 = vector.multi_reduction <maximumf>, %216, %cst_69 [1] : vector<8x8xf32> to vector<8xf32>
    %218 = vector.shape_cast %217 : vector<8xf32> to vector<8x1xf32>
    %219 = vector.broadcast %218 : vector<8x1xf32> to vector<8x8xf32>
    %220 = arith.subf %216, %219 : vector<8x8xf32>
    %221 = math.exp %220 : vector<8x8xf32>
    %cst_70 = arith.constant dense<0.000000e+00> : vector<8xf32>
    %222 = vector.multi_reduction <add>, %221, %cst_70 [1] : vector<8x8xf32> to vector<8xf32>
    %223 = vector.shape_cast %222 : vector<8xf32> to vector<8x1xf32>
    %224 = vector.broadcast %223 : vector<8x1xf32> to vector<8x8xf32>
    %225 = arith.divf %221, %224 : vector<8x8xf32>
    %226 = arith.truncf %225 : vector<8x8xf32> to vector<8x8xbf16>
    %cst_71 = arith.constant dense<0.000000e+00> : vector<8x16xf32>
    %227 = tpu.matmul %226, %211, %cst_71 {dimension_numbers = #tpu.dot_dimension_numbers<[1], [0], [0], [1], [0, 0, 1, 1], [], []>} : vector<8x8xbf16>, vector<8x16xbf16>, vector<8x16xf32> -> vector<8x16xf32>
    %228 = tpu.concatenate %161, %183, %205, %227 in 1 : vector<8x16xf32>, vector<8x16xf32>, vector<8x16xf32>, vector<8x16xf32> -> vector<8x64xf32>
    %229 = tpu.concatenate %134, %228 in 0 : vector<8x64xf32>, vector<8x64xf32> -> vector<16x64xf32>
    %c0_72 = arith.constant 0 : index
    %c0_73 = arith.constant 0 : index
    %c0_74 = arith.constant 0 : index
    %230 = vector.load %arg7[%c0_72, %c0_73, %c0_74] : memref<1x64x64xbf16, #tpu.memory_space<vmem>>, vector<1x64x64xbf16>
    %231 = vector.shape_cast %230 : vector<1x64x64xbf16> to vector<64x64xbf16>
    %c0_75 = arith.constant 0 : index
    %c0_76 = arith.constant 0 : index
    %c0_77 = arith.constant 0 : index
    %232 = vector.load %arg8[%c0_75, %c0_76, %c0_77] : memref<1x1x64xf32, #tpu.memory_space<vmem>>, vector<1x1x64xf32>
    %233 = vector.shape_cast %232 : vector<1x1x64xf32> to vector<1x64xf32>
    %234 = arith.truncf %229 : vector<16x64xf32> to vector<16x64xbf16>
    %cst_78 = arith.constant dense<0.000000e+00> : vector<16x64xf32>
    %235 = tpu.matmul %234, %231, %cst_78 {dimension_numbers = #tpu.dot_dimension_numbers<[1], [0], [0], [1], [0, 0, 1, 1], [], []>} : vector<16x64xbf16>, vector<64x64xbf16>, vector<16x64xf32> -> vector<16x64xf32>
    %236 = vector.broadcast %233 : vector<1x64xf32> to vector<16x64xf32>
    %237 = arith.addf %235, %236 : vector<16x64xf32>
    %238 = arith.addf %3, %237 : vector<16x64xf32>
    %c0_79 = arith.constant 0 : index
    %c0_80 = arith.constant 0 : index
    %c0_81 = arith.constant 0 : index
    %239 = vector.load %arg9[%c0_79, %c0_80, %c0_81] : memref<1x1x64xf32, #tpu.memory_space<vmem>>, vector<1x1x64xf32>
    %240 = vector.shape_cast %239 : vector<1x1x64xf32> to vector<1x64xf32>
    %c0_82 = arith.constant 0 : index
    %c0_83 = arith.constant 0 : index
    %c0_84 = arith.constant 0 : index
    %241 = vector.load %arg10[%c0_82, %c0_83, %c0_84] : memref<1x1x64xf32, #tpu.memory_space<vmem>>, vector<1x1x64xf32>
    %242 = vector.shape_cast %241 : vector<1x1x64xf32> to vector<1x64xf32>
    %cst_85 = arith.constant dense<0.000000e+00> : vector<16xf32>
    %243 = vector.multi_reduction <add>, %238, %cst_85 [1] : vector<16x64xf32> to vector<16xf32>
    %244 = vector.shape_cast %243 : vector<16xf32> to vector<16x1xf32>
    %cst_86 = arith.constant 6.400000e+01 : f32
    %245 = vector.broadcast %cst_86 : f32 to vector<16x1xf32>
    %246 = arith.divf %244, %245 : vector<16x1xf32>
    %247 = vector.broadcast %246 : vector<16x1xf32> to vector<16x64xf32>
    %248 = arith.subf %238, %247 : vector<16x64xf32>
    %249 = arith.mulf %248, %248 : vector<16x64xf32>
    %cst_87 = arith.constant dense<0.000000e+00> : vector<16xf32>
    %250 = vector.multi_reduction <add>, %249, %cst_87 [1] : vector<16x64xf32> to vector<16xf32>
    %251 = vector.shape_cast %250 : vector<16xf32> to vector<16x1xf32>
    %cst_88 = arith.constant 6.400000e+01 : f32
    %252 = vector.broadcast %cst_88 : f32 to vector<16x1xf32>
    %253 = arith.divf %251, %252 : vector<16x1xf32>
    %254 = vector.broadcast %246 : vector<16x1xf32> to vector<16x64xf32>
    %255 = arith.subf %238, %254 : vector<16x64xf32>
    %cst_89 = arith.constant 9.99999974E-6 : f32
    %256 = vector.broadcast %cst_89 : f32 to vector<16x1xf32>
    %257 = arith.addf %253, %256 : vector<16x1xf32>
    %258 = math.rsqrt %257 : vector<16x1xf32>
    %259 = vector.broadcast %258 : vector<16x1xf32> to vector<16x64xf32>
    %260 = arith.mulf %255, %259 : vector<16x64xf32>
    %261 = vector.broadcast %240 : vector<1x64xf32> to vector<16x64xf32>
    %262 = arith.mulf %260, %261 : vector<16x64xf32>
    %263 = vector.broadcast %242 : vector<1x64xf32> to vector<16x64xf32>
    %264 = arith.addf %262, %263 : vector<16x64xf32>
    %c0_90 = arith.constant 0 : index
    %c0_91 = arith.constant 0 : index
    %c0_92 = arith.constant 0 : index
    %265 = vector.load %arg11[%c0_90, %c0_91, %c0_92] : memref<1x64x256xbf16, #tpu.memory_space<vmem>>, vector<1x64x256xbf16>
    %266 = vector.shape_cast %265 : vector<1x64x256xbf16> to vector<64x256xbf16>
    %c0_93 = arith.constant 0 : index
    %c0_94 = arith.constant 0 : index
    %c0_95 = arith.constant 0 : index
    %267 = vector.load %arg12[%c0_93, %c0_94, %c0_95] : memref<1x1x256xf32, #tpu.memory_space<vmem>>, vector<1x1x256xf32>
    %268 = vector.shape_cast %267 : vector<1x1x256xf32> to vector<1x256xf32>
    %269 = arith.truncf %264 : vector<16x64xf32> to vector<16x64xbf16>
    %cst_96 = arith.constant dense<0.000000e+00> : vector<16x256xf32>
    %270 = tpu.matmul %269, %266, %cst_96 {dimension_numbers = #tpu.dot_dimension_numbers<[1], [0], [0], [1], [0, 0, 1, 1], [], []>} : vector<16x64xbf16>, vector<64x256xbf16>, vector<16x256xf32> -> vector<16x256xf32>
    %271 = vector.broadcast %268 : vector<1x256xf32> to vector<16x256xf32>
    %272 = arith.addf %270, %271 : vector<16x256xf32>
    %cst_97 = arith.constant 5.000000e-01 : f32
    %273 = vector.broadcast %cst_97 : f32 to vector<16x256xf32>
    %274 = arith.mulf %273, %272 : vector<16x256xf32>
    %cst_98 = arith.constant 4.471500e-02 : f32
    %275 = vector.broadcast %cst_98 : f32 to vector<16x256xf32>
    %276 = arith.mulf %275, %272 : vector<16x256xf32>
    %277 = arith.mulf %276, %272 : vector<16x256xf32>
    %278 = arith.mulf %277, %272 : vector<16x256xf32>
    %279 = arith.addf %272, %278 : vector<16x256xf32>
    %cst_99 = arith.constant 0.797884583 : f32
    %280 = vector.broadcast %cst_99 : f32 to vector<16x256xf32>
    %281 = arith.mulf %280, %279 : vector<16x256xf32>
    %282 = math.tanh %281 : vector<16x256xf32>
    %cst_100 = arith.constant 1.000000e+00 : f32
    %283 = vector.broadcast %cst_100 : f32 to vector<16x256xf32>
    %284 = arith.addf %283, %282 : vector<16x256xf32>
    %285 = arith.mulf %274, %284 : vector<16x256xf32>
    %c0_101 = arith.constant 0 : index
    %c0_102 = arith.constant 0 : index
    %c0_103 = arith.constant 0 : index
    %286 = vector.load %arg13[%c0_101, %c0_102, %c0_103] : memref<1x256x64xbf16, #tpu.memory_space<vmem>>, vector<1x256x64xbf16>
    %287 = vector.shape_cast %286 : vector<1x256x64xbf16> to vector<256x64xbf16>
    %c0_104 = arith.constant 0 : index
    %c0_105 = arith.constant 0 : index
    %c0_106 = arith.constant 0 : index
    %288 = vector.load %arg14[%c0_104, %c0_105, %c0_106] : memref<1x1x64xf32, #tpu.memory_space<vmem>>, vector<1x1x64xf32>
    %289 = vector.shape_cast %288 : vector<1x1x64xf32> to vector<1x64xf32>
    %290 = arith.truncf %285 : vector<16x256xf32> to vector<16x256xbf16>
    %cst_107 = arith.constant dense<0.000000e+00> : vector<16x64xf32>
    %291 = tpu.matmul %290, %287, %cst_107 {dimension_numbers = #tpu.dot_dimension_numbers<[1], [0], [0], [1], [0, 0, 1, 1], [], []>} : vector<16x256xbf16>, vector<256x64xbf16>, vector<16x64xf32> -> vector<16x64xf32>
    %292 = vector.broadcast %289 : vector<1x64xf32> to vector<16x64xf32>
    %293 = arith.addf %291, %292 : vector<16x64xf32>
    %294 = arith.addf %238, %293 : vector<16x64xf32>
    %c0_108 = arith.constant 0 : index
    %c0_109 = arith.constant 0 : index
    %295 = vector.load %arg21[%c0_108, %c0_109] : memref<16x64xf32, #tpu.memory_space<vmem>>, vector<16x64xf32>
    tpu.vector_store %arg21[%c0_108, %c0_109], %294 {strides = array<i32>} : memref<16x64xf32, #tpu.memory_space<vmem>>, vector<16x64xf32>,
    %c1_i32 = arith.constant 1 : i32
    %296 = arith.cmpi eq, %arg0, %c1_i32 : i32
    %297 = arith.extui %296 : i1 to i32
    %c0_i32_110 = arith.constant 0 : i32
    %298 = arith.cmpi ne, %297, %c0_i32_110 : i32
    scf.if %298 {
      %c0_111 = arith.constant 0 : index
      %c0_112 = arith.constant 0 : index
      %299 = vector.load %arg15[%c0_111, %c0_112] : memref<1x64xf32, #tpu.memory_space<vmem>>, vector<1x64xf32>
      %c0_113 = arith.constant 0 : index
      %c0_114 = arith.constant 0 : index
      %300 = vector.load %arg16[%c0_113, %c0_114] : memref<1x64xf32, #tpu.memory_space<vmem>>, vector<1x64xf32>
      %cst_115 = arith.constant dense<0.000000e+00> : vector<16xf32>
      %301 = vector.multi_reduction <add>, %294, %cst_115 [1] : vector<16x64xf32> to vector<16xf32>
      %302 = vector.shape_cast %301 : vector<16xf32> to vector<16x1xf32>
      %cst_116 = arith.constant 6.400000e+01 : f32
      %303 = vector.broadcast %cst_116 : f32 to vector<16x1xf32>
      %304 = arith.divf %302, %303 : vector<16x1xf32>
      %305 = vector.broadcast %304 : vector<16x1xf32> to vector<16x64xf32>
      %306 = arith.subf %294, %305 : vector<16x64xf32>
      %307 = arith.mulf %306, %306 : vector<16x64xf32>
      %cst_117 = arith.constant dense<0.000000e+00> : vector<16xf32>
      %308 = vector.multi_reduction <add>, %307, %cst_117 [1] : vector<16x64xf32> to vector<16xf32>
      %309 = vector.shape_cast %308 : vector<16xf32> to vector<16x1xf32>
      %cst_118 = arith.constant 6.400000e+01 : f32
      %310 = vector.broadcast %cst_118 : f32 to vector<16x1xf32>
      %311 = arith.divf %309, %310 : vector<16x1xf32>
      %312 = vector.broadcast %304 : vector<16x1xf32> to vector<16x64xf32>
      %313 = arith.subf %294, %312 : vector<16x64xf32>
      %cst_119 = arith.constant 9.99999974E-6 : f32
      %314 = vector.broadcast %cst_119 : f32 to vector<16x1xf32>
      %315 = arith.addf %311, %314 : vector<16x1xf32>
      %316 = math.rsqrt %315 : vector<16x1xf32>
      %317 = vector.broadcast %316 : vector<16x1xf32> to vector<16x64xf32>
      %318 = arith.mulf %313, %317 : vector<16x64xf32>
      %319 = vector.broadcast %299 : vector<1x64xf32> to vector<16x64xf32>
      %320 = arith.mulf %318, %319 : vector<16x64xf32>
      %321 = vector.broadcast %300 : vector<1x64xf32> to vector<16x64xf32>
      %322 = arith.addf %320, %321 : vector<16x64xf32>
      %c0_120 = arith.constant 0 : index
      %c0_121 = arith.constant 0 : index
      %323 = vector.load %arg19[%c0_120, %c0_121] : memref<16x64xf32, #tpu.memory_space<vmem>>, vector<16x64xf32>
      %cst_122 = arith.constant 3.000000e-01 : f32
      %324 = vector.broadcast %cst_122 : f32 to vector<16x64xf32>
      %325 = arith.cmpf oge, %323, %324 : vector<16x64xf32>
      %cst_123 = arith.constant 1.42857146 : f32
      %326 = vector.broadcast %cst_123 : f32 to vector<16x64xf32>
      %327 = arith.mulf %322, %326 : vector<16x64xf32>
      %cst_124 = arith.constant 0.000000e+00 : f32
      %328 = vector.broadcast %cst_124 : f32 to vector<16x64xf32>
      %329 = arith.select %325, %327, %328 : vector<16x64xi1>, vector<16x64xf32>
      %c0_125 = arith.constant 0 : index
      %c0_126 = arith.constant 0 : index
      %330 = vector.load %arg17[%c0_125, %c0_126] : memref<64x128xbf16, #tpu.memory_space<vmem>>, vector<64x128xbf16>
      %c0_127 = arith.constant 0 : index
      %c0_128 = arith.constant 0 : index
      %331 = vector.load %arg18[%c0_127, %c0_128] : memref<1x128xf32, #tpu.memory_space<vmem>>, vector<1x128xf32>
      %332 = arith.truncf %329 : vector<16x64xf32> to vector<16x64xbf16>
      %cst_129 = arith.constant dense<0.000000e+00> : vector<16x128xf32>
      %333 = tpu.matmul %332, %330, %cst_129 {dimension_numbers = #tpu.dot_dimension_numbers<[1], [0], [0], [1], [0, 0, 1, 1], [], []>} : vector<16x64xbf16>, vector<64x128xbf16>, vector<16x128xf32> -> vector<16x128xf32>
      %334 = vector.broadcast %331 : vector<1x128xf32> to vector<16x128xf32>
      %335 = arith.addf %333, %334 : vector<16x128xf32>
      %c0_130 = arith.constant 0 : index
      %c0_131 = arith.constant 0 : index
      %336 = vector.load %arg20[%c0_130, %c0_131] : memref<16x128xf32, #tpu.memory_space<vmem>>, vector<16x128xf32>
      tpu.vector_store %arg20[%c0_130, %c0_131], %335 {strides = array<i32>} : memref<16x128xf32, #tpu.memory_space<vmem>>, vector<16x128xf32>,
    } else {
    }
    return
  }
  func.func @transform_0(%arg0: i32) -> (i32, i32) {
    %c0_i32 = arith.constant 0 : i32
    %c0_i32_0 = arith.constant 0 : i32
    %c0_i32_1 = arith.constant 0 : i32
    return %c0_i32, %c0_i32_0 : i32, i32
  }
  func.func @transform_1(%arg0: i32) -> (i32, i32) {
    %c0_i32 = arith.constant 0 : i32
    %c0_i32_0 = arith.constant 0 : i32
    %c0_i32_1 = arith.constant 0 : i32
    return %c0_i32, %c0_i32_0 : i32, i32
  }
  func.func @transform_2(%arg0: i32) -> (i32, i32, i32) {
    %c0_i32 = arith.constant 0 : i32
    %c0_i32_0 = arith.constant 0 : i32
    %c0_i32_1 = arith.constant 0 : i32
    return %arg0, %c0_i32, %c0_i32_0 : i32, i32, i32
  }
  func.func @transform_3(%arg0: i32) -> (i32, i32, i32) {
    %c0_i32 = arith.constant 0 : i32
    %c0_i32_0 = arith.constant 0 : i32
    %c0_i32_1 = arith.constant 0 : i32
    return %arg0, %c0_i32, %c0_i32_0 : i32, i32, i32
  }
  func.func @transform_4(%arg0: i32) -> (i32, i32, i32) {
    %c0_i32 = arith.constant 0 : i32
    %c0_i32_0 = arith.constant 0 : i32
    %c0_i32_1 = arith.constant 0 : i32
    return %arg0, %c0_i32, %c0_i32_0 : i32, i32, i32
  }
  func.func @transform_5(%arg0: i32) -> (i32, i32, i32) {
    %c0_i32 = arith.constant 0 : i32
    %c0_i32_0 = arith.constant 0 : i32
    %c0_i32_1 = arith.constant 0 : i32
    return %arg0, %c0_i32, %c0_i32_0 : i32, i32, i32
  }
  func.func @transform_6(%arg0: i32) -> (i32, i32, i32) {
    %c0_i32 = arith.constant 0 : i32
    %c0_i32_0 = arith.constant 0 : i32
    %c0_i32_1 = arith.constant 0 : i32
    return %arg0, %c0_i32, %c0_i32_0 : i32, i32, i32
  }
  func.func @transform_7(%arg0: i32) -> (i32, i32, i32) {
    %c0_i32 = arith.constant 0 : i32
    %c0_i32_0 = arith.constant 0 : i32
    %c0_i32_1 = arith.constant 0 : i32
    return %arg0, %c0_i32, %c0_i32_0 : i32, i32, i32
  }
  func.func @transform_8(%arg0: i32) -> (i32, i32, i32) {
    %c0_i32 = arith.constant 0 : i32
    %c0_i32_0 = arith.constant 0 : i32
    %c0_i32_1 = arith.constant 0 : i32
    return %arg0, %c0_i32, %c0_i32_0 : i32, i32, i32
  }
  func.func @transform_9(%arg0: i32) -> (i32, i32, i32) {
    %c0_i32 = arith.constant 0 : i32
    %c0_i32_0 = arith.constant 0 : i32
    %c0_i32_1 = arith.constant 0 : i32
    return %arg0, %c0_i32, %c0_i32_0 : i32, i32, i32
  }
  func.func @transform_10(%arg0: i32) -> (i32, i32, i32) {
    %c0_i32 = arith.constant 0 : i32
    %c0_i32_0 = arith.constant 0 : i32
    %c0_i32_1 = arith.constant 0 : i32
    return %arg0, %c0_i32, %c0_i32_0 : i32, i32, i32
  }
  func.func @transform_11(%arg0: i32) -> (i32, i32, i32) {
    %c0_i32 = arith.constant 0 : i32
    %c0_i32_0 = arith.constant 0 : i32
    %c0_i32_1 = arith.constant 0 : i32
    return %arg0, %c0_i32, %c0_i32_0 : i32, i32, i32
  }
  func.func @transform_12(%arg0: i32) -> (i32, i32, i32) {
    %c0_i32 = arith.constant 0 : i32
    %c0_i32_0 = arith.constant 0 : i32
    %c0_i32_1 = arith.constant 0 : i32
    return %arg0, %c0_i32, %c0_i32_0 : i32, i32, i32
  }
  func.func @transform_13(%arg0: i32) -> (i32, i32, i32) {
    %c0_i32 = arith.constant 0 : i32
    %c0_i32_0 = arith.constant 0 : i32
    %c0_i32_1 = arith.constant 0 : i32
    return %arg0, %c0_i32, %c0_i32_0 : i32, i32, i32
  }
  func.func @transform_14(%arg0: i32) -> (i32, i32) {
    %c0_i32 = arith.constant 0 : i32
    %c0_i32_0 = arith.constant 0 : i32
    %c0_i32_1 = arith.constant 0 : i32
    return %c0_i32, %c0_i32_0 : i32, i32
  }
  func.func @transform_15(%arg0: i32) -> (i32, i32) {
    %c0_i32 = arith.constant 0 : i32
    %c0_i32_0 = arith.constant 0 : i32
    %c0_i32_1 = arith.constant 0 : i32
    return %c0_i32, %c0_i32_0 : i32, i32
  }
  func.func @transform_16(%arg0: i32) -> (i32, i32) {
    %c0_i32 = arith.constant 0 : i32
    %c0_i32_0 = arith.constant 0 : i32
    %c0_i32_1 = arith.constant 0 : i32
    return %c0_i32, %c0_i32_0 : i32, i32
  }
  func.func @transform_17(%arg0: i32) -> (i32, i32) {
    %c0_i32 = arith.constant 0 : i32
    %c0_i32_0 = arith.constant 0 : i32
    %c0_i32_1 = arith.constant 0 : i32
    return %c0_i32, %c0_i32_0 : i32, i32
  }
  func.func @transform_18(%arg0: i32) -> (i32, i32) {
    %c0_i32 = arith.constant 0 : i32
    %c0_i32_0 = arith.constant 0 : i32
    %c0_i32_1 = arith.constant 0 : i32
    return %c0_i32, %c0_i32_0 : i32, i32
  }
  func.func @transform_19(%arg0: i32) -> (i32, i32) {
    %c0_i32 = arith.constant 0 : i32
    %c0_i32_0 = arith.constant 0 : i32
    %c0_i32_1 = arith.constant 0 : i32
    return %c0_i32, %c0_i32_0 : i32, i32
  }
}

</mosaic_0001>

<bundles_post_ra>
// kernel: tpu_custom_call.1
= control target key start
LH: loop header
LB: loop body
LE: loop exit
PB: predicated region body
PF: predicated region fallthrough
CT: control target
= control target key end

     0   :  { %s3864_s0 = inlined_call_operand.vmem [shape: f32[16,64], index: 0, kind: input, shape index: {}]   ;;  %s3865_s1 = inlined_call_operand.hbm [shape: f32[2,8], index: 1, kind: input, shape index: {}]   ;;  %s3866_s2 = inlined_call_operand.hbm [shape: f32[2,1,64], index: 2, kind: input, shape index: {}]   ;;  %s3867_s3 = inlined_call_operand.hbm [shape: f32[2,1,64], index: 3, kind: input, shape index: {}]   ;;  %s3868_s4 = inlined_call_operand.vmem [shape: bf16[2,64,192], index: 4, kind: input, shape index: {}]   ;;  %s3869_s5 = inlined_call_operand.vmem [shape: f32[2,1,192], index: 5, kind: input, shape index: {}]   ;;  %s3870_s6 = inlined_call_operand.vmem [shape: bf16[2,64,64], index: 6, kind: input, shape index: {}]   ;;  %s3871_s7 = inlined_call_operand.hbm [shape: f32[2,1,64], index: 7, kind: input, shape index: {}]   ;;  %s3872_s8 = inlined_call_operand.hbm [shape: f32[2,1,64], index: 8, kind: input, shape index: {}]   ;;  %s3873_s9 = inlined_call_operand.hbm [shape: f32[2,1,64], index: 9, kind: input, shape index: {}]   ;;  %s3874_s10 = inlined_call_operand.vmem [shape: bf16[2,64,256], index: 10, kind: input, shape index: {}]   ;;  %s3875_s11 = inlined_call_operand.vmem [shape: f32[2,1,256], index: 11, kind: input, shape index: {}]   ;;  %s3876_s12 = inlined_call_operand.vmem [shape: bf16[2,256,64], index: 12, kind: input, shape index: {}]   ;;  %s3877_s13 = inlined_call_operand.hbm [shape: f32[2,1,64], index: 13, kind: input, shape index: {}]   ;;  %s3878_s14 = inlined_call_operand.vmem [shape: f32[1,64], index: 14, kind: input, shape index: {}]   ;;  %s3879_s15 = inlined_call_operand.vmem [shape: f32[1,64], index: 15, kind: input, shape index: {}]   ;;  %s3880_s16 = inlined_call_operand.vmem [shape: bf16[64,128], index: 16, kind: input, shape index: {}]   ;;  %s3881_s17 = inlined_call_operand.vmem [shape: f32[1,128], index: 17, kind: input, shape index: {}]   ;;  %s3882_s18 = inlined_call_operand.vmem [shape: f32[16,64], index: 18, kind: input, shape index: {}]   ;;  %s3883_s19 = inlined_call_operand.hbm [shape: f32[16,128], index: 19, kind: output, shape index: {}]  }
   0x1   :  { %3896 = sst [smem:[#allocation24_spill]] %s3864_s0 }
   0x2   :  { %3897 = sst [smem:[#allocation25_spill]] %s3865_s1 }
   0x3   :  { %3898 = sst [smem:[#allocation26_spill]] %s3866_s2 }
   0x4   :  { %3899 = sst [smem:[#allocation27_spill]] %s3867_s3 }
   0x5   :  { %3900 = sst [smem:[#allocation28_spill]] %s3868_s4 }
   0x6   :  { %3901 = sst [smem:[#allocation29_spill]] %s3871_s7 }
   0x7   :  { %3902 = sst [smem:[#allocation30_spill]] %s3873_s9 }
   0x8   :  { %3903 = sst [smem:[#allocation31_spill]] %s3878_s14 }
   0x9   :  { %3904 = sst [smem:[#allocation32_spill]] %s3879_s15 }
   0xa   :  { %3905 = sst [smem:[#allocation33_spill]] %s3880_s16 }
   0xb   :  { %3906 = sst [smem:[#allocation34_spill]] %s3881_s17 }
   0xc   :  { %3907 = sst [smem:[#allocation35_spill]] %s3882_s18 }
   0xd   :  { %3908 = sst [smem:[#allocation36_spill]] %s3883_s19 }
   0xe   :  { %24 = vsyncpa [#allocation4], 0 }
   0xf   :  { %25 = vsyncpa [#allocation7], 0 }
  0x10   :  { %27 = vsyncpa [#allocation7 + $0x1], 0 }
  0x11   :  { %28 = vsyncpa [#allocation10], 0 }
  0x12   :  { %30 = vsyncpa [#allocation10 + $0x1], 0 }
  0x13   :  { %31 = vsyncpa [#allocation13], 0 }
  0x14   :  { %33 = vsyncpa [#allocation13 + $0x1], 0 }
  0x15   :  { %34 = vsyncpa [#allocation5], 0  ;;  %s3256_s0 = smov 0   ;;  %s3258_s30 = smov 0  }
  0x16   :  { %s3260_s20 = smov 0   ;;  %s3262_s21 = smov 0  }
  0x17 LB: > { %3909 = sst [smem:[#allocation21_spill]] %s3137_s20  ;;  %s3277_s1 = sadd.s32 1, %s3141_s21   ;;  %s3141_s21 = sphi %s3262_s21, %s3942_s21   ;;  %s3137_s20 = sphi %s3260_s20, %s3947_s20   ;;  %s3133_s30 = sphi %s3258_s30, %s3946_s30   ;;  %s3129_s0 = sphi %s3256_s0, %s3945_s0  }
  0x18   : > { %3910 = sst [smem:[#allocation22_spill]] %s3277_s1  ;;  %s89_s22 = sadd.s32 1, %s3137_s20 }
  0x19   : > { %s86_s2 = ssub.s32 %s3141_s21, %s3277_s1  ;;  %p96_p0 = scmp.ne.s32.totalorder %s3137_s20, %s3133_s30 }
  0x1a   : > { %p87_p1 = scmp.eq.s32.totalorder %s86_s2, 0  ;;  %p97_p2 = scmp.eq.s32.totalorder %s3141_s21, 0 }
  0x1b   : > { %p2724_p3 = scmp.lt.s32.totalorder %s3141_s21, 2  ;;  %s3290_s24 = sand.u32 1, %s3141_s21  }
  0x1c   : > { %s3287_s23 = scalar_select %p87_p1, %s3137_s20, %s89_s22  }
  0x1d   : > { %p98_p4 = por %p97_p2, %p96_p0  ;;  %s3293_s25 = sand.u32 1, %s3137_s20  }
  0x1e   : > { %3911 = sst [smem:[#allocation23_spill]] %s3287_s23  ;;  %s571_s1 = scalar_lea.vmem [#allocation6], %s3293_s25 }
  0x1f   : > { %s3912_s27 = sld [smem:[#allocation26_spill]]  ;;  %s578_s19 = sshll.u32 %s571_s1, 4  ;;  %s579_s19 = int_to_ptr.vmem [resolvable:$true] %s578_s19 }
  0x20   : > { %p3300_p5 = pnand %p2724_p3, %p98_p4  ;;  %s3914_s7 = sld [smem:[#allocation29_spill]] }
  0x21   : > { %s3893_s18 = scalar_lea.sflag [#allocation7], %s3290_s24 }
  0x22   : > { %p3313_p7 = pneg %p3300_p5 }
  0x25   : > { %s574_s28 = scalar_lea.hbm %s3912_s27, %s3141_s21  ;;  %s2860_s22 = scalar_lea.hbm %s3912_s27, 2 }
  0x26   : > { %s576_s29 = sshll.u32 %s574_s28, 4  ;;  %s631_s20 = scalar_lea.hbm %s3914_s7, %s3141_s21  ;;  %s577_s29 = int_to_ptr.hbm [resolvable:$true] %s576_s29 }
  0x27   : > { %s3308_s17 = sshll.u32 %s631_s20, 4  ;;  %s2853_s3 = sshra.s32 %s577_s29, 4  ;;  %s2854_s3 = int_to_ptr.hbm [resolvable:$true] %s2853_s3  ;;  %s634_s17 = int_to_ptr.hbm [resolvable:$true] %s3308_s17 }
  0x28   : > { %s2855_s26 = scalar_lea.hbm %s2854_s3, 1  ;;  %p2861_p10 = scmp.lt.s32.totalorder %s2854_s3, %s3912_s27 }
  0x29   : > { %p2856_p6 = scmp.ne.s32.totalorder %s2854_s3, %s2855_s26  ;;  %p2862_p11 = scmp.lt.s32.totalorder %s2860_s22, %s2855_s26 }
  0x2b   : > { %p2858_p8 = pnand %p3313_p7, %p2856_p6  ;;  %p2863_p12 = por %p2862_p11, %p2861_p10 }
  0x2d   : > { %p2859_p9 = pneg %p2858_p8 }
  0x2f   : > { %p2864_p13 = pnand %p2863_p12, %p2859_p9 }
  0x31   : > { %2867 = shalt.err (!%p2864_p13)
}
  0x32   : > { %2707 = dma.hbm_to_vmem [thread:$0]  (!%p3300_p5), %s577_s29, 16, %s579_s19, %s3893_s18  }
  0x33   : > { %s628_s28 = scalar_lea.vmem [#allocation9], %s3293_s25  ;;  %s3895_s14 = scalar_lea.sflag [#allocation10], %s3290_s24 }
  0x34   : > { %s635_s23 = sshll.u32 %s628_s28, 4  ;;  %s2883_s15 = sshra.s32 %s634_s17, 4  ;;  %s636_s23 = int_to_ptr.vmem [resolvable:$true] %s635_s23  ;;  %s2884_s15 = int_to_ptr.hbm [resolvable:$true] %s2883_s15 }
  0x35   : > { %s2885_s3 = scalar_lea.hbm %s2884_s15, 1  ;;  %s2890_s20 = scalar_lea.hbm %s3914_s7, 2 }
  0x36   : > { %p2886_p0 = scmp.ne.s32.totalorder %s2884_s15, %s2885_s3  ;;  %p2891_p3 = scmp.lt.s32.totalorder %s2884_s15, %s3914_s7 }
  0x37   : > { %p2892_p4 = scmp.lt.s32.totalorder %s2890_s20, %s2885_s3 }
  0x38   : > { %p2888_p1 = pnand %p2886_p0, %p3313_p7 }
  0x39   : > { %p2893_p6 = por %p2892_p4, %p2891_p3 }
  0x3a   : > { %p2889_p2 = pneg %p2888_p1 }
  0x3c   : > { %p2894_p8 = pnand %p2893_p6, %p2889_p2 }
  0x3e   : > { %2897 = shalt.err (!%p2894_p8)
}
  0x3f   : > { %2713 = dma.hbm_to_vmem [thread:$0]  (!%p3300_p5), %s634_s17, 16, %s636_s23, %s3895_s14  }
  0x40   : > { %s3916_s9 = sld [smem:[#allocation30_spill]]  ;;  %s662_s16 = scalar_lea.vmem [#allocation12], %s3293_s25 }
  0x41   : > { %s669_s27 = sshll.u32 %s662_s16, 4  ;;  %s3894_s15 = scalar_lea.sflag [#allocation13], %s3290_s24  ;;  %s670_s27 = int_to_ptr.vmem [resolvable:$true] %s669_s27 }
  0x46   : > { %s665_s28 = scalar_lea.hbm %s3916_s9, %s3141_s21  ;;  %s2920_s17 = scalar_lea.hbm %s3916_s9, 2 }
  0x47   : > { %s667_s26 = sshll.u32 %s665_s28, 4  ;;  %s668_s26 = int_to_ptr.hbm [resolvable:$true] %s667_s26 }
  0x48   : > { %s2913_s3 = sshra.s32 %s668_s26, 4  ;;  %s2914_s3 = int_to_ptr.hbm [resolvable:$true] %s2913_s3 }
  0x49   : > { %s2915_s22 = scalar_lea.hbm %s2914_s3, 1  ;;  %p2921_p12 = scmp.lt.s32.totalorder %s2914_s3, %s3916_s9 }
  0x4a   : > { %p2916_p9 = scmp.ne.s32.totalorder %s2914_s3, %s2915_s22  ;;  %p2922_p13 = scmp.lt.s32.totalorder %s2920_s17, %s2915_s22 }
  0x4c   : > { %p2918_p10 = pnand %p2916_p9, %p3313_p7  ;;  %p2923_p0 = por %p2922_p13, %p2921_p12 }
  0x4e   : > { %p2919_p11 = pneg %p2918_p10 }
  0x50   : > { %p2924_p1 = pnand %p2923_p0, %p2919_p11 }
  0x52   : > { %2927 = shalt.err (!%p2924_p1)
}
  0x53   : > { %2719 = dma.hbm_to_vmem [thread:$0]  (!%p3300_p5), %s668_s26, 16, %s670_s27, %s3894_s15  }
  0x54   : > { %s3363_s18 = sadd.s32 4294967295, %s3141_s21   ;;  %p102_p3 = scmp.ne.s32.totalorder %s3133_s30, %s3129_s0 }
  0x55   : > { %p103_p2 = scmp.eq.s32.totalorder %s3363_s18, 0  ;;  %p2433_p4 = scmp.ge.s32.totalorder %s3141_s21, 1 }
  0x56   : > { %p525_p6 = scmp.lt.s32.totalorder %s3141_s21, 3  ;;  %p2434_p8 = scmp.ne.s32.totalorder %s3363_s18, 0 }
  0x57   : > { %p3373_p9 = por %p103_p2, %p102_p3  ;;  %s3918_s26 = sld [smem:[#allocation25_spill]] }
  0x58   : > { %p3380_p10 = pnand %p2433_p4, %p525_p6  ;;  %s3143_s0 = smov [#allocation3]  }
  0x59   : > { %s542_s22 = sshll.u32 %s3143_s0, 4  ;;  %s3920_s23 = sld [smem:[#allocation27_spill]]  ;;  %s543_s22 = int_to_ptr.vmem [resolvable:$true] %s542_s22 }
  0x5a   : > { %p2700_p11 = pneg %p3380_p10  ;;  %s588_s16 = scalar_lea.vmem [#allocation8], %s3293_s25 }
  0x5c   : > { %p2701_p12 = pnand %p2700_p11, %p103_p2 }
  0x5d   : > { %s540_s27 = sshll.u32 %s3918_s26, 4  ;;  %s595_s26 = sshll.u32 %s588_s16, 4  ;;  %s541_s27 = int_to_ptr.hbm [resolvable:$true] %s540_s27  ;;  %s596_s26 = int_to_ptr.vmem [resolvable:$true] %s595_s26 }
  0x5e   : > { %2703 = dma.hbm_to_vmem [thread:$0]  (!%p2701_p12), %s541_s27, 32, %s543_s22, [#allocation4]  }
  0x5f   : > { %s591_s19 = scalar_lea.hbm %s3920_s23, %s3141_s21  ;;  %s2980_s20 = scalar_lea.hbm %s3920_s23, 2 }
  0x60   : > { %s593_s28 = sshll.u32 %s591_s19, 4  ;;  %s594_s28 = int_to_ptr.hbm [resolvable:$true] %s593_s28 }
  0x61   : > { %s2973_s15 = sshra.s32 %s594_s28, 4  ;;  %s2974_s15 = int_to_ptr.hbm [resolvable:$true] %s2973_s15 }
  0x62   : > { %s2975_s14 = scalar_lea.hbm %s2974_s15, 1  ;;  %p2981_p3 = scmp.lt.s32.totalorder %s2974_s15, %s3920_s23 }
  0x63   : > { %p2976_p13 = scmp.ne.s32.totalorder %s2974_s15, %s2975_s14  ;;  %p2982_p4 = scmp.lt.s32.totalorder %s2980_s20, %s2975_s14 }
  0x65   : > { %p2978_p0 = pnand %p2976_p13, %p3313_p7  ;;  %p2983_p6 = por %p2982_p4, %p2981_p3 }
  0x67   : > { %p2979_p1 = pneg %p2978_p0 }
  0x69   : > { %p2984_p11 = pnand %p2983_p6, %p2979_p1 }
  0x6b   : > { %2987 = shalt.err (!%p2984_p11)
}
  0x6c   : > { %s3921_s27 = scalar_lea.sflag [#allocation7], %s3290_s24  ;;  %s648_s7 = scalar_lea.hbm %s3872_s8, %s3141_s21 }
  0x6d   : > { %2710 = dma.hbm_to_vmem [thread:$0]  (!%p3300_p5), %s594_s28, 16, %s596_s26, %s3921_s27  }
  0x6e   : > { %s650_s16 = sshll.u32 %s648_s7, 4  ;;  %s645_s0 = scalar_lea.vmem [#allocation11], %s3293_s25  ;;  %s651_s16 = int_to_ptr.hbm [resolvable:$true] %s650_s16 }
  0x6f   : > { %s652_s9 = sshll.u32 %s645_s0, 4  ;;  %s3003_s14 = sshra.s32 %s651_s16, 4  ;;  %s653_s9 = int_to_ptr.vmem [resolvable:$true] %s652_s9  ;;  %s3004_s14 = int_to_ptr.hbm [resolvable:$true] %s3003_s14 }
  0x70   : > { %s3005_s15 = scalar_lea.hbm %s3004_s14, 1  ;;  %s3010_s28 = scalar_lea.hbm %s3872_s8, 2 }
  0x71   : > { %p3006_p12 = scmp.ne.s32.totalorder %s3004_s14, %s3005_s15  ;;  %p3011_p1 = scmp.lt.s32.totalorder %s3004_s14, %s3872_s8 }
  0x72   : > { %p3012_p3 = scmp.lt.s32.totalorder %s3010_s28, %s3005_s15 }
  0x73   : > { %p3008_p13 = pnand %p3006_p12, %p3313_p7 }
  0x74   : > { %p3013_p4 = por %p3012_p3, %p3011_p1 }
  0x75   : > { %p3009_p0 = pneg %p3008_p13 }
  0x77   : > { %p3014_p6 = pnand %p3013_p4, %p3009_p0 }
  0x79   : > { %3017 = shalt.err (!%p3014_p6)
}
  0x7a   : > { %s3922_s22 = scalar_lea.sflag [#allocation10], %s3290_s24  ;;  %s705_s0 = scalar_lea.hbm %s3877_s13, %s3141_s21 }
  0x7b   : > { %2716 = dma.hbm_to_vmem [thread:$0]  (!%p3300_p5), %s651_s16, 16, %s653_s9, %s3922_s22  }
  0x7c   : > { %s707_s20 = sshll.u32 %s705_s0, 4  ;;  %s702_s17 = scalar_lea.vmem [#allocation14], %s3293_s25  ;;  %s708_s20 = int_to_ptr.hbm [resolvable:$true] %s707_s20 }
  0x7d   : > { %s709_s26 = sshll.u32 %s702_s17, 4  ;;  %s3033_s14 = sshra.s32 %s708_s20, 4  ;;  %s710_s26 = int_to_ptr.vmem [resolvable:$true] %s709_s26  ;;  %s3034_s14 = int_to_ptr.hbm [resolvable:$true] %s3033_s14 }
  0x7e   : > { %s3035_s15 = scalar_lea.hbm %s3034_s14, 1  ;;  %s3040_s16 = scalar_lea.hbm %s3877_s13, 2 }
  0x7f   : > { %p3036_p11 = scmp.ne.s32.totalorder %s3034_s14, %s3035_s15  ;;  %p3041_p0 = scmp.lt.s32.totalorder %s3034_s14, %s3877_s13 }
  0x80   : > { %p3042_p1 = scmp.lt.s32.totalorder %s3040_s16, %s3035_s15 }
  0x81   : > { %p3038_p12 = pnand %p3036_p11, %p3313_p7 }
  0x82   : > { %p3043_p3 = por %p3042_p1, %p3041_p0 }
  0x83   : > { %p3039_p13 = pneg %p3038_p12 }
  0x85   : > { %p3044_p4 = pnand %p3043_p3, %p3039_p13 }
  0x87   : > { %3047 = shalt.err (!%p3044_p4)
}
  0x88   : > { %s3923_s21 = scalar_lea.sflag [#allocation13], %s3290_s24  ;;  %718 = sbr.rel (%p3380_p10) target bundleno = 3350 (0xd16), region = 96 }
  0x89   : > { %2722 = dma.hbm_to_vmem [thread:$0]  (!%p3300_p5), %s708_s20, 16, %s710_s26, %s3923_s21  }
  0x8d   : > { %3108 = dma.done.wait (%p103_p2), [#allocation4], 32  }
  0x8e   : > { %3110 = vsyncadd (%p103_p2), [#allocation4], 4294967264  ;;  %s725_s25 = sand.u32 1, %s3363_s18   ;;  %s3447_s1 = sand.u32 1, %s3133_s30  }
  0x8f   : > { %s726_s2 = scalar_lea.sflag [#allocation7], %s725_s25 }
  0x90   : > { %3112 = dma.done.wait (%p3373_p9), %s726_s2, 32  }
  0x91   : > { %3114 = vsyncadd (%p3373_p9), %s726_s2, 4294967264  ;;  %s744_s3 = scalar_lea.sflag [#allocation10], %s725_s25 }
  0x92   : > { %3116 = dma.done.wait (%p3373_p9), %s744_s3, 32  }
  0x93   : > { %3118 = vsyncadd (%p3373_p9), %s744_s3, 4294967264  ;;  %s762_s20 = scalar_lea.sflag [#allocation13], %s725_s25 }
  0x94   : > { %3120 = dma.done.wait (%p3373_p9), %s762_s20, 32  }
  0x95   : > { %3122 = vsyncadd (%p3373_p9), %s762_s20, 4294967264  ;;  %p871_p5 = scmp.lt.s32.totalorder %s3363_s18, 1  ;;  %s3924_s4 = sld [smem:[#allocation28_spill]] }
  0x96   : > { %s3925_s17 = sld [smem:[#allocation24_spill]] (!%p2434_p8) }
  0x97   : > { %s872_s26 = scalar_select %p871_p5, %s3363_s18, 1 }
  0x99   : > { %s2636_s14 = sshll.u32 %s872_s26, 6  ;;  %s2440_s15 = sshll.u32 %s872_s26, 1 }
  0x9a   : > { %s3476_s21 = scalar_lea.vmem %s3869_s5, %s2440_s15  ;;  %s2637_s25 = sshll.u32 %s872_s26, 5 }
  0x9b   : > { %s3471_s16 = scalar_lea.vmem %s3924_s4, %s2636_s14  ;;  %s3481_s3 = scalar_lea.vmem %s3874_s10, %s2636_s14 }
  0x9c   : > { %s3486_s0 = scalar_lea.vmem %s3870_s6, %s2637_s25  ;;  %s3491_s27 = scalar_lea.vmem %s3875_s11, %s2440_s15 }
  0x9d   : > { %s2639_s24 = sshll.u32 %s872_s26, 7  ;;  %s773_s4 = scalar_lea.vmem [#allocation14], %s3447_s1 }
  0x9e   : > { %s3496_s19 = scalar_lea.vmem %s3876_s12, %s2639_s24  ;;  %903 = sbr.rel (%p2434_p8) target bundleno = 166 (0xa6), region = 128 }
  0xa3   : > { %v904_v0 = vld [vmem:[%s3925_s17] sm:$0xff]  ;;  %vm906_vm0 = vcmask 523264   ;;  %v905_v1 = vld [vmem:[%s3925_s17 + $0x8] sm:$0xff] }
  0xa4   : > { %907 = vst.msk [vmem:[#allocation2] sm:$0xff] %vm906_vm0, %v904_v0 }
  0xa5   : > { %908 = vst.msk [vmem:[#allocation2 + $0x8] sm:$0xff] %vm906_vm0, %v905_v1 }
  0xa6 PF: > { %vm913_vm1 = vcmask 523264   ;;  %v3144_v6 = vmov 64.0   ;;  %v2475_v23 = vld [vmem:[%s3471_s16 + $0x30] sm:$0xf]  ;;  %v2647_v24 = vld [vmem:[%s3471_s16 + $0x34] sm:$0xf0] }
  0xa7   : > { %2794 = vrcp.f32 %v3144_v6  ;;  %v2476_v25 = vor.u32 %v2647_v24, %v2475_v23  ;;  %v2467_v26 = vld [vmem:[%s3471_s16 + $0x20] sm:$0xf]  ;;  %v2645_v27 = vld [vmem:[%s3471_s16 + $0x24] sm:$0xf0]  ;;  %v2459_v29 = vld [vmem:[%s3471_s16 + $0x10] sm:$0xf] }
  0xa8   : > { %v2468_v28 = vor.u32 %v2645_v27, %v2467_v26  ;;  %v2643_v30 = vld [vmem:[%s3471_s16 + $0x14] sm:$0xf0]  ;;  %v2451_v32 = vld [vmem:[%s3471_s16] sm:$0xf]  ;;  %v2641_v33 = vld [vmem:[%s3471_s16 + $0x4] sm:$0xf0] }
  0xa9   : > { %1037 = vmatpush.bf16.msra.mxu1 %v2476_v25  ;;  %v2460_v31 = vor.u32 %v2643_v30, %v2459_v29  ;;  %v2452_v35 = vor.u32 %v2641_v33, %v2451_v32  ;;  %v2646_v38 = vld [vmem:[%s3471_s16 + $0x34] sm:$0xf]  ;;  %v2477_v39 = vld [vmem:[%s3471_s16 + $0x38] sm:$0xf0]  ;;  %v2644_v41 = vld [vmem:[%s3471_s16 + $0x24] sm:$0xf]  ;;  %v1061_v30 = vlaneseq }
  0xaa   : > { %v2480_v40 = vor.u32 %v2646_v38, %v2477_v39  ;;  %v2469_v42 = vld [vmem:[%s3471_s16 + $0x28] sm:$0xf0]  ;;  %v2642_v46 = vld [vmem:[%s3471_s16 + $0x14] sm:$0xf]  ;;  %v2461_v47 = vld [vmem:[%s3471_s16 + $0x18] sm:$0xf0] }
  0xab   : > { %v909_v2 = vld [vmem:[#allocation2] sm:$0xff]  ;;  %v2472_v44 = vor.u32 %v2644_v41, %v2469_v42  ;;  %v2464_v51 = vor.u32 %v2642_v46, %v2461_v47  ;;  %v2453_v53 = vld [vmem:[%s3471_s16 + $0x8] sm:$0xf0]  ;;  %s3926_s24 = scalar_lea.vmem [#allocation6], %s3447_s1  ;;  %s3927_s7 = scalar_lea.vmem [#allocation8], %s3447_s1  ;;  %vm1128_vm9 = vcmask 1043456  }
  0xac   : > { %v914_v3 = vsel %vm913_vm1, %v909_v2, 0.0  ;;  %v910_v4 = vld [vmem:[#allocation2 + $0x8] sm:$0xff]  ;;  %v2640_v52 = vld [vmem:[%s3471_s16 + $0x4] sm:$0xf]  ;;  %s3145_s26 = smov 48   ;;  %s3146_s15 = smov 64  }
  0xad   : > { %915 = vadd.xlane.f32.xlu0 %v914_v3  ;;  %v917_v5 = vsel %vm913_vm1, %v910_v4, 0.0  ;;  %v2795_v7 = vpop.eup %2794  ;;  %1038 = vmatpush.bf16.msra.mxu1 %v2468_v28  ;;  %v2456_v56 = vor.u32 %v2640_v52, %v2453_v53  ;;  %vm1077_vm10 = vcmask 130048   ;;  %v1066_v29 = vld [vmem:[#allocation3] sm:$0x1]  ;;  %v3571_v33 = vshrl.u32 %v1061_v30, 7  ;;  %s3148_s16 = smov 112  }
  0xae   : > { %v921_v8 = vmul.f32 64.0, %v2795_v7  ;;  %vm925_vm2 = vweird.f32 %v2795_v7  ;;  %vm1067_vm11 = vcmp.gt.f32.partialorder %v1066_v29, 0.5  ;;  %vm1099_vm15 = vcmask 64512   ;;  %s3150_s20 = smov 80   ;;  %s3151_s28 = smov 96  }
  0xaf   : > { %s3152_s9 = smov 32   ;;  %s3934_s22 = scalar_lea.vmem [#allocation12], %s3447_s1 }
  0xb0   : > { %v922_v9 = vsub.f32 1.0, %v921_v8  ;;  %p2614_p7 = scmp.ne.s32.totalorder %s3363_s18, 1 }
  0xb1   : > { %1039 = vmatpush.bf16.msra.mxu1 %v2460_v31  ;;  %v3147_v31 = vmov 0   ;;  %s3940_s14 = sld [smem:[#allocation34_spill]] (!%p2614_p7) }
  0xb2   : > { %v923_v10 = vmul.f32 %v2795_v7, %v922_v9  ;;  %v1068_v32 = vsel %vm1067_vm11, 1, %v3147_v31 }
  0xb4   : > { %v924_v11 = vadd.f32 %v2795_v7, %v923_v10 }
  0xb5   : > { %918 = vadd.xlane.f32.xlu0 %v917_v5  ;;  %1040 = vmatpush.bf16.msra.mxu1 %v2452_v35  ;;  %v1069_v35 = vperm.slane %v1068_v32, 0 }
  0xb6   : > { %v3509_v12 = vsel %vm925_vm2, %v2795_v7, %v924_v11  ;;  %v2789_v7 = vld [vmem:[%s3927_s7] ss:$0 sm:$0xff] }
  0xb7   : > { %vm1070_vm13 = vcmp.eq.s32.totalorder %v1069_v35, 1 }
  0xb9   : > { %1051 = vmatpush.bf16.msrb.mxu1 %v2480_v40 }
  0xbd   : > { %1052 = vmatpush.bf16.msrb.mxu1 %v2472_v44 }
  0xc1   : > { %1053 = vmatpush.bf16.msrb.mxu1 %v2464_v51 }
  0xc5   : > { %1054 = vmatpush.bf16.msrb.mxu1 %v2456_v56 }
 0x120   : > { %v916_v13 = vpop.xlane.xlu0 %915 }
 0x121   : > { %v927_v14 = vmul.f32 %v3509_v12, %v916_v13  ;;  %v3550_v13 = vld [vmem:[%s3476_s21] sm:$0x3]  ;;  %s3149_s21 = smov 16  }
 0x123   : > { %v3512_v15 = vsub.f32 %v909_v2, %v927_v14  ;;  %v2788_v2 = vld [vmem:[%s3926_s24] ss:$0 sm:$0xff]  ;;  %v986_v14 = vperm.slane %v3550_v13, 0 }
 0x125   : > { %v931_v16 = vmul.f32 %v3512_v15, %v3512_v15 }
 0x127   : > { %v933_v17 = vsel %vm913_vm1, %v931_v16, 0.0 }
 0x128   : > { %934 = vadd.xlane.f32.xlu1 %v933_v17  ;;  %v919_v18 = vpop.xlane.xlu0 %918 }
 0x129   : > { %v928_v19 = vmul.f32 %v3509_v12, %v919_v18 }
 0x12b   : > { %v3518_v20 = vsub.f32 %v910_v4, %v928_v19 }
 0x12d   : > { %v932_v21 = vmul.f32 %v3518_v20, %v3518_v20 }
 0x12f   : > { %v936_v22 = vsel %vm913_vm1, %v932_v21, 0.0 }
 0x130   : > { %937 = vadd.xlane.f32.xlu1 %v936_v22 }
 0x19b   : > { %v935_v34 = vpop.xlane.xlu1 %934 }
 0x19c   : > { %v939_v36 = vmul.f32 %v935_v34, %v3509_v12  ;;  %v3573_v34 = vand.u32 127, %v1061_v30 }
 0x19e   : > { %v941_v37 = vadd.f32 1e-05, %v939_v36  ;;  %vm1065_vm12 = vcmp.le.s32.totalorder %v3573_v34, %v3571_v33 }
 0x19f   : > { %vm3580_vm14 = vmand %vm1065_vm12, %vm1070_vm13 }
 0x1a0   : > { %2796 = vrsqrt.f32 %v941_v37  ;;  %vm949_vm4 = vweird.f32 %v941_v37 }
 0x1a3   : > { %v938_v43 = vpop.xlane.xlu1 %937 }
 0x1a4   : > { %v940_v45 = vmul.f32 %v938_v43, %v3509_v12 }
 0x1a6   : > { %v2797_v48 = vpop.eup %2796  ;;  %v942_v49 = vadd.f32 1e-05, %v940_v45 }
 0x1a7   : > { %v944_v50 = vmul.f32 %v2797_v48, %v941_v37  ;;  %vm950_vm3 = vweird.f32 %v2797_v48 }
 0x1a8   : > { %2798 = vrsqrt.f32 %v942_v49  ;;  %vm951_vm5 = vmor %vm949_vm4, %vm950_vm3  ;;  %vm959_vm7 = vweird.f32 %v942_v49 }
 0x1a9   : > { %v945_v54 = vmul.f32 %v2797_v48, %v944_v50 }
 0x1ab   : > { %v946_v55 = vmul.f32 0.5, %v945_v54 }
 0x1ad   : > { %v947_v57 = vsub.f32 1.5, %v946_v55 }
 0x1ae   : > { %v2799_v58 = vpop.eup %2798 }
 0x1af   : > { %v948_v59 = vmul.f32 %v2797_v48, %v947_v57  ;;  %v954_v60 = vmul.f32 %v2799_v58, %v942_v49  ;;  %vm960_vm6 = vweird.f32 %v2799_v58 }
 0x1b0   : > { %vm961_vm8 = vmor %vm959_vm7, %vm960_vm6 }
 0x1b1   : > { %v955_v61 = vmul.f32 %v2799_v58, %v954_v60  ;;  %v952_v62 = vsel %vm951_vm5, %v2797_v48, %v948_v59 }
 0x1b2   : > { %v963_v1 = vmul.f32 %v952_v62, %v3512_v15 }
 0x1b3   : > { %v956_v63 = vmul.f32 0.5, %v955_v61 }
 0x1b4   : > { %v968_v6 = vmul.f32 %v2788_v2, %v963_v1 }
 0x1b5   : > { %v957_v0 = vsub.f32 1.5, %v956_v63 }
 0x1b6   : > { %v973_v9 = vadd.f32 %v2789_v7, %v968_v6 }
 0x1b7   : > { %v958_v3 = vmul.f32 %v2799_v58, %v957_v0 }
 0x1b9   : > { %v962_v4 = vsel %vm961_vm8, %v2799_v58, %v958_v3 }
 0x1ba   : > { %v964_v5 = vmul.f32 %v962_v4, %v3518_v20  ;;  %v987_v20 = vperm.slane %v3550_v13, 1 }
 0x1bc   : > { %v969_v8 = vmul.f32 %v2788_v2, %v964_v5 }
 0x1be   : > { %v974_v10 = vadd.f32 %v2789_v7, %v969_v8 }
 0x1c0   : > { %v984_v11 = vpack.c.bf16 %v974_v10, %v973_v9 }
 0x1c2   : > { %2481 = vmatmul.msk.bf16.vlgmr.msra.gmra.mxu1 %vm913_vm1, %v984_v11 }
 0x1d2   : > { %2482 = vmatmul.msk.bf16.vlgmr.msrb.gmra.mxu1 %vm913_vm1, %v984_v11 }
 0x23f   : > { %v1042_v15 = vpop.f32.mrf.mxu1 }
 0x240   : > { %v1043_v16 = vadd.f32 %v1042_v15, %v986_v14 }
 0x242   : > { %v3553_v17 = vpack.c.bf16 %v1043_v16, %v1043_v16 }
 0x244   : > { %1147 = vrot.lane.b32.xlu1 %v3553_v17, %s3145_s26  ;;  %1075 = vrot.lane.b32.xlu2 %v3553_v17, %s3146_s15 }
 0x247   : > { %v1044_v18 = vpop.f32.mrf.mxu1 }
 0x248   : > { %v1045_v19 = vadd.f32 %v1044_v18, %v986_v14 }
 0x24a   : > { %v3595_v42 = vpack.c.bf16 %v1045_v19, %v1045_v19 }
 0x24f   : > { %v1056_v21 = vpop.f32.mrf.mxu1 }
 0x250   : > { %v1057_v22 = vadd.f32 %v1056_v21, %v987_v20 }
 0x252   : > { %v3562_v23 = vpack.c.bf16 %v1057_v22, %v1057_v22 }
 0x254   : > { %v1130_v24 = vsel %vm1128_vm9, %v3562_v23, 0 }
 0x255   : > { %1139 = vmatpush.bf16.msra.mxu3 %v1130_v24 }
 0x29e   : > { %v1076_v25 = vpop.permute.xlu2 %1075 }
 0x29f   : > { %v1082_v26 = vsel %vm1077_vm10, %v1076_v25, 0 }
 0x2a0   : > { %1091 = vmatpush.bf16.xpose.msra.mxu2 %v1082_v26 }
 0x2a7   : > { %2483 = vmatmul.msk.bf16.vlgmr.msra.gmra.mxu2 %vm1077_vm10, %v3553_v17 }
 0x2b6   : > { %v1148_v27 = vpop.permute.xlu1 %1147 }
 0x2b7   : > { %v1153_v28 = vsel %vm1077_vm10, %v1148_v27, 0 }
 0x2b8   : > { %1162 = vmatpush.bf16.xpose.msrb.mxu3 %v1153_v28 }
 0x32a   : > { %v1093_v36 = vpop.f32.mrf.mxu2 }
 0x32b   : > { %v1097_v38 = vmul.f32 0.25, %v1093_v36 }
 0x32d   : > { %v1098_v39 = vsel %vm3580_vm14, %v1097_v38, -1e+30 }
 0x32e   : > { %v1100_v40 = vsel %vm1099_vm15, %v1098_v39, -inf }
 0x32f   : > { %1101 = vmax.xlane.f32.xlu2 %v1100_v40 }
 0x332   : > { %v1095_v41 = vpop.f32.mrf.mxu2 }
 0x347   : > { %1196 = vrot.lane.b32.xlu2 %v3562_v23, %s3148_s16 }
 0x34f   : > { %1290 = vrot.lane.b32.xlu2 %v3553_v17, %s3149_s21 }
 0x357   : > { %1288 = vrot.lane.b32.xlu2 %v3553_v17, %s3150_s20 }
 0x35f   : > { %1217 = vrot.lane.b32.xlu2 %v3553_v17, %s3151_s28 }
 0x367   : > { %1452 = vrot.lane.b32.xlu2 %v3595_v42, %s3148_s16 }
 0x36f   : > { %1385 = vrot.lane.b32.xlu2 %v3595_v42, %s3146_s15  ;;  %s3936_s15 = sld [smem:[#allocation31_spill]] (!%p2614_p7) }
 0x377   : > { %1526 = vrot.lane.b32.xlu2 %v3595_v42, %s3152_s9 }
 0x3a2   : > { %v1102_v43 = vpop.xlane.xlu2 %1101 }
 0x3a3   : > { %v1103_v44 = vsub.f32 %v1098_v39, %v1102_v43 }
 0x3a5   : > { %v1104_v45 = vmul.f32 1.442695, %v1103_v44 }
 0x3a7   : > { %2800 = vpow2.f32 %v1104_v45 }
 0x3aa   : > { %v1197_v60 = vpop.permute.xlu2 %1196 }
 0x3ab   : > { %v1202_v62 = vsel %vm1128_vm9, %v1197_v60, 0 }
 0x3ad   : > { %v2801_v46 = vpop.eup %2800 }
 0x3ae   : > { %v1106_v47 = vsel %vm1099_vm15, %v2801_v46, 0.0 }
 0x3af   : > { %1107 = vadd.xlane.f32.xlu0 %v1106_v47 }
 0x3b2   : > { %v1291_v63 = vpop.permute.xlu2 %1290 }
 0x3b3   : > { %v1296_v1 = vsel %vm1077_vm10, %v1291_v63, 0 }
 0x3ba   : > { %v1289_v9 = vpop.permute.xlu2 %1288 }
 0x3c2   : > { %v1218_v10 = vpop.permute.xlu2 %1217 }
 0x3c3   : > { %1145 = vrot.lane.b32.xlu0 %v3553_v17, %s3148_s16 }
 0x3ca   : > { %v1453_v16 = vpop.permute.xlu2 %1452 }
 0x3d2   : > { %v1386_v21 = vpop.permute.xlu2 %1385 }
 0x3da   : > { %v1527_v25 = vpop.permute.xlu2 %1526 }
 0x3db   : > { %v1532_v26 = vsel %vm1077_vm10, %v1527_v25, 0 }
 0x422   : > { %v1108_v48 = vpop.xlane.xlu0 %1107 }
 0x423   : > { %2802 = vrcp.f32 %v1108_v48  ;;  %v1120_v52 = vand.u32 2147483648, %v1108_v48  ;;  %v1118_v54 = vand.u32 2147483647, %v1108_v48  ;;  %vm1114_vm2 = vweird.f32 %v1108_v48 }
 0x425   : > { %v1121_v56 = vor.u32 1.1754944e-38, %v1120_v52  ;;  %vm1119_vm4 = vcmp.eq.f32.partialorder %v1118_v54, 8.507059e+37 }
 0x429   : > { %v2803_v49 = vpop.eup %2802 }
 0x42a   : > { %v1110_v50 = vmul.f32 %v2803_v49, %v1108_v48  ;;  %vm1115_vm0 = vweird.f32 %v2803_v49 }
 0x42b   : > { %vm1116_vm3 = vmor %vm1114_vm2, %vm1115_vm0 }
 0x42c   : > { %v1111_v51 = vsub.f32 1.0, %v1110_v50 }
 0x42e   : > { %v1112_v53 = vmul.f32 %v2803_v49, %v1111_v51 }
 0x430   : > { %v1113_v55 = vadd.f32 %v2803_v49, %v1112_v53 }
 0x432   : > { %v1117_v57 = vsel %vm1116_vm3, %v2803_v49, %v1113_v55 }
 0x433   : > { %v1122_v58 = vsel %vm1119_vm4, %v1121_v56, %v1117_v57  ;;  %v1376_v57 = vld [vmem:[#allocation3 + $0x1] sm:$0x1] }
 0x434   : > { %v1123_v59 = vmul.f32 %v2801_v46, %v1122_v58  ;;  %vm1377_vm11 = vcmp.gt.f32.partialorder %v1376_v57, 0.5 }
 0x435   : > { %v1146_v0 = vpop.permute.xlu0 %1145 }
 0x436   : > { %v1124_v61 = vpack.c.bf16 %v1123_v59, %v1123_v59 }
 0x438   : > { %2484 = vmatmul.msk.bf16.vlgmr.msra.gmra.mxu3 %vm1099_vm15, %v1124_v61 }
 0x439   : > { %1211 = vmatpush.bf16.msra.mxu3 %v1202_v62  ;;  %v1378_v62 = vsel %vm1377_vm11, 1, %v3147_v31 }
 0x43a   : > { %v1379_v63 = vperm.slane %v1378_v62, 0 }
 0x43c   : > { %vm1380_vm13 = vcmp.eq.s32.totalorder %v1379_v63, 1 }
 0x43d   : > { %vm3652_vm0 = vmand %vm1065_vm12, %vm1380_vm13 }
 0x448   : > { %2485 = vmatmul.msk.bf16.vlgmr.msrb.gmra.mxu3 %vm1077_vm10, %v1146_v0 }
 0x449   : > { %1305 = vmatpush.bf16.xpose.msrb.mxu3 %v1296_v1 }
 0x4bb   : > { %v3610_v2 = vpop.f32.mrf.mxu3 }
 0x4c3   : > { %v1143_v3 = vpop.f32.mrf.mxu3 }
 0x4cb   : > { %v1164_v4 = vpop.f32.mrf.mxu3 }
 0x4cc   : > { %v1168_v5 = vmul.f32 0.25, %v1164_v4 }
 0x4ce   : > { %v1169_v6 = vsel %vm3580_vm14, %v1168_v5, -1e+30 }
 0x4cf   : > { %v1170_v7 = vsel %vm1099_vm15, %v1169_v6, -inf }
 0x4d0   : > { %1171 = vmax.xlane.f32.xlu1 %v1170_v7 }
 0x4d3   : > { %v1166_v8 = vpop.f32.mrf.mxu3 }
 0x4e9   : > { %1219 = vrot.lane.b32.xlu1 %v3553_v17, %s3152_s9  ;;  %v1391_v17 = vsel %vm1077_vm10, %v1386_v21, 0 }
 0x4f1   : > { %1595 = vrot.lane.b32.xlu1 %v3595_v42, %s3150_s20 }
 0x543   : > { %v1172_v11 = vpop.xlane.xlu1 %1171 }
 0x544   : > { %v1173_v14 = vsub.f32 %v1169_v6, %v1172_v11 }
 0x546   : > { %v1174_v15 = vmul.f32 1.442695, %v1173_v14 }
 0x548   : > { %2804 = vpow2.f32 %v1174_v15 }
 0x54e   : > { %v2805_v18 = vpop.eup %2804 }
 0x54f   : > { %v1176_v19 = vsel %vm1099_vm15, %v2805_v18, 0.0 }
 0x550   : > { %1177 = vadd.xlane.f32.xlu0 %v1176_v19 }
 0x55b   : > { %v1220_v22 = vpop.permute.xlu1 %1219 }
 0x55c   : > { %v1225_v24 = vsel %vm1077_vm10, %v1220_v22, 0 }
 0x55d   : > { %1234 = vmatpush.bf16.xpose.msra.mxu0 %v1225_v24 }
 0x563   : > { %v1596_v56 = vpop.permute.xlu1 %1595 }
 0x564   : > { %1454 = vrot.lane.b32.xlu0 %v3595_v42, %s3145_s26  ;;  %2487 = vmatmul.msk.bf16.vlgmr.msra.gmra.mxu0 %vm1077_vm10, %v1218_v10 }
 0x565   : > { %1400 = vmatpush.bf16.xpose.msrb.mxu0 %v1391_v17 }
 0x56c   : > { %1597 = vrot.lane.b32.xlu0 %v3595_v42, %s3149_s21 }
 0x56d   : > { %1541 = vmatpush.bf16.xpose.msra.mxu0 %v1532_v26 }
 0x574   : > { %1524 = vrot.lane.b32.xlu0 %v3595_v42, %s3151_s28  ;;  %2491 = vmatmul.msk.bf16.vlgmr.msrb.gmra.mxu0 %vm1077_vm10, %v3595_v42 }
 0x5c3   : > { %v1178_v27 = vpop.xlane.xlu0 %1177 }
 0x5c4   : > { %2806 = vrcp.f32 %v1178_v27  ;;  %v1190_v32 = vand.u32 2147483648, %v1178_v27  ;;  %v1188_v36 = vand.u32 2147483647, %v1178_v27  ;;  %vm1184_vm6 = vweird.f32 %v1178_v27 }
 0x5c6   : > { %v1191_v39 = vor.u32 1.1754944e-38, %v1190_v32  ;;  %vm1189_vm8 = vcmp.eq.f32.partialorder %v1188_v36, 8.507059e+37 }
 0x5ca   : > { %v2807_v28 = vpop.eup %2806 }
 0x5cb   : > { %v1180_v29 = vmul.f32 %v2807_v28, %v1178_v27  ;;  %vm1185_vm5 = vweird.f32 %v2807_v28 }
 0x5cc   : > { %vm1186_vm7 = vmor %vm1184_vm6, %vm1185_vm5 }
 0x5cd   : > { %v1181_v30 = vsub.f32 1.0, %v1180_v29 }
 0x5cf   : > { %v1182_v35 = vmul.f32 %v2807_v28, %v1181_v30 }
 0x5d1   : > { %v1183_v38 = vadd.f32 %v2807_v28, %v1182_v35 }
 0x5d3   : > { %v1187_v40 = vsel %vm1186_vm7, %v2807_v28, %v1183_v38 }
 0x5d4   : > { %v1192_v41 = vsel %vm1189_vm8, %v1191_v39, %v1187_v40 }
 0x5d5   : > { %v1193_v43 = vmul.f32 %v2805_v18, %v1192_v41 }
 0x5d6   : > { %v1455_v44 = vpop.permute.xlu0 %1454 }
 0x5d7   : > { %v1460_v42 = vsel %vm1077_vm10, %v1455_v44, 0  ;;  %v1194_v45 = vpack.c.bf16 %v1193_v43, %v1193_v43 }
 0x5d9   : > { %2486 = vmatmul.msk.bf16.vlgmr.msra.gmra.mxu3 %vm1099_vm15, %v1194_v45 }
 0x5da   : > { %1469 = vmatpush.bf16.xpose.msra.mxu3 %v1460_v42 }
 0x5de   : > { %v1598_v46 = vpop.permute.xlu0 %1597 }
 0x5df   : > { %v1603_v52 = vsel %vm1077_vm10, %v1598_v46, 0 }
 0x5e1   : > { %v1236_v47 = vpop.f32.mrf.mxu0 }
 0x5e2   : > { %v1240_v48 = vmul.f32 0.25, %v1236_v47 }
 0x5e4   : > { %v1241_v49 = vsel %vm3580_vm14, %v1240_v48, -1e+30 }
 0x5e5   : > { %v1242_v50 = vsel %vm1099_vm15, %v1241_v49, -inf }
 0x5e6   : > { %v1525_v51 = vpop.permute.xlu0 %1524  ;;  %1243 = vmax.xlane.f32.xlu2 %v1242_v50 }
 0x5e7   : > { %2495 = vmatmul.msk.bf16.vlgmr.msra.gmra.mxu0 %vm1077_vm10, %v1525_v51 }
 0x5e9   : > { %v1238_v53 = vpop.f32.mrf.mxu0  ;;  %2489 = vmatmul.msk.bf16.vlgmr.msrb.gmra.mxu3 %vm1077_vm10, %v1289_v9 }
 0x5ea   : > { %1612 = vmatpush.bf16.xpose.msrb.mxu3 %v1603_v52  ;;  %v1058_v53 = vpop.f32.mrf.mxu1 }
 0x5f1   : > { %v1402_v54 = vpop.f32.mrf.mxu0 }
 0x5f2   : > { %v1406_v34 = vmul.f32 0.25, %v1402_v54 }
 0x5f4   : > { %v1407_v15 = vsel %vm3652_vm0, %v1406_v34, -1e+30 }
 0x5f9   : > { %v1404_v55 = vpop.f32.mrf.mxu0  ;;  %2493 = vmatmul.msk.bf16.vlgmr.msra.gmra.mxu3 %vm1077_vm10, %v1453_v16  ;;  %v1408_v16 = vsel %vm1099_vm15, %v1407_v15, -inf }
 0x609   : > { %2497 = vmatmul.msk.bf16.vlgmr.msrb.gmra.mxu3 %vm1077_vm10, %v1596_v56 }
 0x659   : > { %v1244_v58 = vpop.xlane.xlu2 %1243 }
 0x65a   : > { %v1245_v59 = vsub.f32 %v1241_v49, %v1244_v58  ;;  %v1059_v58 = vadd.f32 %v1058_v53, %v987_v20 }
 0x65c   : > { %v1246_v60 = vmul.f32 1.442695, %v1245_v59  ;;  %v3642_v61 = vpop.f32.mrf.mxu3  ;;  %v1383_v63 = vpack.c.bf16 %v1059_v58, %v1059_v58 }
 0x65e   : > { %2808 = vpow2.f32 %v1246_v60 }
 0x664   : > { %v3645_v0 = vpop.eup %2808  ;;  %v1215_v1 = vpop.f32.mrf.mxu3 }
 0x665   : > { %v1543_v3 = vpop.f32.mrf.mxu0  ;;  %v1248_v5 = vsel %vm1099_vm15, %v3645_v0, 0.0 }
 0x666   : > { %v1547_v4 = vmul.f32 0.25, %v1543_v3  ;;  %1249 = vadd.xlane.f32.xlu2 %v1248_v5 }
 0x668   : > { %v3658_v31 = vsel %vm3652_vm0, %v1547_v4, -1e+30 }
 0x669   : > { %v1549_v7 = vsel %vm1099_vm15, %v3658_v31, -inf }
 0x66a   : > { %1550 = vmax.xlane.f32.xlu0 %v1549_v7  ;;  %v1437_v7 = vsel %vm1128_vm9, %v1383_v63, 0 }
 0x66c   : > { %v1307_v8 = vpop.f32.mrf.mxu3 }
 0x66d   : > { %v1545_v9 = vpop.f32.mrf.mxu0  ;;  %v1311_v10 = vmul.f32 0.25, %v1307_v8 }
 0x66f   : > { %v1312_v11 = vsel %vm3580_vm14, %v1311_v10, -1e+30 }
 0x670   : > { %v1313_v33 = vsel %vm1099_vm15, %v1312_v11, -inf }
 0x671   : > { %1314 = vmax.xlane.f32.xlu1 %v1313_v33 }
 0x674   : > { %v1309_v14 = vpop.f32.mrf.mxu3 }
 0x679   : > { %1409 = vmax.xlane.f32.xlu1 %v1408_v16 }
 0x67c   : > { %v1471_v18 = vpop.f32.mrf.mxu3 }
 0x67d   : > { %v1475_v19 = vmul.f32 0.25, %v1471_v18 }
 0x67f   : > { %v1476_v21 = vsel %vm3652_vm0, %v1475_v19, -1e+30 }
 0x680   : > { %v1477_v22 = vsel %vm1099_vm15, %v1476_v21, -inf }
 0x681   : > { %1478 = vmax.xlane.f32.xlu0 %v1477_v22 }
 0x684   : > { %v1473_v37 = vpop.f32.mrf.mxu3 }
 0x68c   : > { %v1614_v24 = vpop.f32.mrf.mxu3 }
 0x68d   : > { %v1618_v17 = vmul.f32 0.25, %v1614_v24 }
 0x68f   : > { %v1619_v25 = vsel %vm3652_vm0, %v1618_v17, -1e+30 }
 0x690   : > { %v1620_v26 = vsel %vm1099_vm15, %v1619_v25, -inf }
 0x691   : > { %1621 = vmax.xlane.f32.xlu2 %v1620_v26 }
 0x694   : > { %v1616_v27 = vpop.f32.mrf.mxu3 }
 0x695   : > { %1267 = vrot.lane.b32.xlu0 %v3562_v23, %s3151_s28 }
 0x6d9   : > { %v1250_v28 = vpop.xlane.xlu2 %1249 }
 0x6da   : > { %2810 = vrcp.f32 %v1250_v28  ;;  %v1262_v52 = vand.u32 2147483648, %v1250_v28  ;;  %vm1256_vm14 = vweird.f32 %v1250_v28  ;;  %v1260_v54 = vand.u32 2147483647, %v1250_v28 }
 0x6dc   : > { %v1263_v59 = vor.u32 1.1754944e-38, %v1262_v52  ;;  %vm1261_vm3 = vcmp.eq.f32.partialorder %v1260_v54, 8.507059e+37 }
 0x6dd   : > { %v1551_v35 = vpop.xlane.xlu0 %1550 }
 0x6de   : > { %v1552_v8 = vsub.f32 %v3658_v31, %v1551_v35 }
 0x6e0   : > { %v2811_v38 = vpop.eup %2810  ;;  %v1553_v9 = vmul.f32 1.442695, %v1552_v8 }
 0x6e1   : > { %v1252_v43 = vmul.f32 %v2811_v38, %v1250_v28  ;;  %vm1257_vm12 = vweird.f32 %v2811_v38 }
 0x6e2   : > { %vm1258_vm2 = vmor %vm1256_vm14, %vm1257_vm12 }
 0x6e3   : > { %v1253_v42 = vsub.f32 1.0, %v1252_v43 }
 0x6e4   : > { %v1315_v29 = vpop.xlane.xlu1 %1314 }
 0x6e5   : > { %v1316_v30 = vsub.f32 %v1312_v11, %v1315_v29  ;;  %v1254_v49 = vmul.f32 %v2811_v38, %v1253_v42 }
 0x6e7   : > { %v1317_v32 = vmul.f32 1.442695, %v1316_v30  ;;  %v1255_v51 = vadd.f32 %v2811_v38, %v1254_v49 }
 0x6e9   : > { %2812 = vpow2.f32 %v1317_v32  ;;  %v1259_v56 = vsel %vm1258_vm2, %v2811_v38, %v1255_v51 }
 0x6ea   : > { %v1264_v60 = vsel %vm1261_vm3, %v1263_v59, %v1259_v56 }
 0x6eb   : > { %v1265_v3 = vmul.f32 %v3645_v0, %v1264_v60 }
 0x6ec   : > { %v1410_v36 = vpop.xlane.xlu1 %1409 }
 0x6ed   : > { %v1411_v39 = vsub.f32 %v1407_v15, %v1410_v36  ;;  %v1266_v13 = vpack.c.bf16 %v1265_v3, %v1265_v3 }
 0x6ef   : > { %v3676_v40 = vpop.eup %2812  ;;  %v1412_v41 = vmul.f32 1.442695, %v1411_v39 }
 0x6f0   : > { %v1319_v44 = vsel %vm1099_vm15, %v3676_v40, 0.0 }
 0x6f1   : > { %2814 = vpow2.f32 %v1412_v41  ;;  %1320 = vadd.xlane.f32.xlu1 %v1319_v44 }
 0x6f4   : > { %v1479_v45 = vpop.xlane.xlu0 %1478 }
 0x6f5   : > { %v1480_v46 = vsub.f32 %v1476_v21, %v1479_v45 }
 0x6f7   : > { %v3680_v47 = vpop.eup %2814  ;;  %v1481_v48 = vmul.f32 1.442695, %v1480_v46 }
 0x6f8   : > { %v1414_v50 = vsel %vm1099_vm15, %v3680_v47, 0.0 }
 0x6f9   : > { %2816 = vpow2.f32 %v1481_v48  ;;  %1415 = vadd.xlane.f32.xlu2 %v1414_v50 }
 0x6ff   : > { %v3684_v55 = vpop.eup %2816 }
 0x700   : > { %v1483_v57 = vsel %vm1099_vm15, %v3684_v55, 0.0 }
 0x701   : > { %1484 = vadd.xlane.f32.xlu0 %v1483_v57 }
 0x704   : > { %v1622_v62 = vpop.xlane.xlu2 %1621 }
 0x705   : > { %v1623_v1 = vsub.f32 %v1619_v25, %v1622_v62 }
 0x707   : > { %v1624_v4 = vmul.f32 1.442695, %v1623_v1  ;;  %v1268_v5 = vpop.permute.xlu0 %1267 }
 0x708   : > { %v1273_v6 = vsel %vm1128_vm9, %v1268_v5, 0 }
 0x709   : > { %2818 = vpow2.f32 %v1624_v4  ;;  %1282 = vmatpush.bf16.msra.mxu1 %v1273_v6 }
 0x70a   : > { %1338 = vrot.lane.b32.xlu1 %v3562_v23, %s3150_s20  ;;  %2820 = vpow2.f32 %v1553_v9 }
 0x70c   : > { %2488 = vmatmul.msk.bf16.vlgmr.msra.gmra.mxu1 %vm1099_vm15, %v1266_v13 }
 0x70d   : > { %1446 = vmatpush.bf16.msrb.mxu1 %v1437_v7 }
 0x70f   : > { %v3696_v20 = vpop.eup %2818 }
 0x710   : > { %v1626_v0 = vsel %vm1099_vm15, %v3696_v20, 0.0  ;;  %v3704_v23 = vpop.eup %2820 }
 0x711   : > { %1627 = vadd.xlane.f32.xlu2 %v1626_v0  ;;  %v1555_v10 = vsel %vm1099_vm15, %v3704_v23, 0.0 }
 0x715   : > { %1645 = vrot.lane.b32.xlu0 %v1383_v63, %s3150_s20  ;;  %s3937_s20 = sld [smem:[#allocation32_spill]] (!%p2614_p7) }
 0x71d   : > { %1574 = vrot.lane.b32.xlu0 %v1383_v63, %s3151_s28 }
 0x729   : > { %1503 = vrot.lane.b32.xlu2 %v1383_v63, %s3148_s16 }
 0x734   : > { %1556 = vadd.xlane.f32.xlu1 %v1555_v10 }
 0x764   : > { %v1321_v11 = vpop.xlane.xlu1 %1320 }
 0x765   : > { %2822 = vrcp.f32 %v1321_v11  ;;  %v1333_v18 = vand.u32 2147483648, %v1321_v11  ;;  %vm1327_vm5 = vweird.f32 %v1321_v11  ;;  %v1331_v21 = vand.u32 2147483647, %v1321_v11 }
 0x767   : > { %v1334_v17 = vor.u32 1.1754944e-38, %v1333_v18  ;;  %vm1332_vm7 = vcmp.eq.f32.partialorder %v1331_v21, 8.507059e+37 }
 0x76b   : > { %v2823_v33 = vpop.eup %2822 }
 0x76c   : > { %v1323_v34 = vmul.f32 %v2823_v33, %v1321_v11  ;;  %v1416_v14 = vpop.xlane.xlu2 %1415  ;;  %vm1328_vm4 = vweird.f32 %v2823_v33 }
 0x76d   : > { %2824 = vrcp.f32 %v1416_v14  ;;  %vm1329_vm6 = vmor %vm1327_vm5, %vm1328_vm4  ;;  %v1428_v26 = vand.u32 2147483648, %v1416_v14  ;;  %v1426_v28 = vand.u32 2147483647, %v1416_v14  ;;  %vm1422_vm11 = vweird.f32 %v1416_v14 }
 0x76e   : > { %v1324_v15 = vsub.f32 1.0, %v1323_v34 }
 0x76f   : > { %v1429_v35 = vor.u32 1.1754944e-38, %v1428_v26  ;;  %vm1427_vm0 = vcmp.eq.f32.partialorder %v1426_v28, 8.507059e+37 }
 0x770   : > { %v1325_v16 = vmul.f32 %v2823_v33, %v1324_v15 }
 0x772   : > { %v1326_v31 = vadd.f32 %v2823_v33, %v1325_v16 }
 0x773   : > { %v2825_v19 = vpop.eup %2824 }
 0x774   : > { %v1418_v22 = vmul.f32 %v2825_v19, %v1416_v14  ;;  %v1485_v37 = vpop.xlane.xlu0 %1484  ;;  %v1330_v24 = vsel %vm1329_vm6, %v2823_v33, %v1326_v31  ;;  %vm1423_vm8 = vweird.f32 %v2825_v19 }
 0x775   : > { %2826 = vrcp.f32 %v1485_v37  ;;  %v1335_v29 = vsel %vm1332_vm7, %v1334_v17, %v1330_v24  ;;  %vm1424_vm13 = vmor %vm1422_vm11, %vm1423_vm8  ;;  %v1497_v51 = vand.u32 2147483648, %v1485_v37  ;;  %vm1491_vm14 = vweird.f32 %v1485_v37 }
 0x776   : > { %v1419_v25 = vsub.f32 1.0, %v1418_v22  ;;  %v1336_v36 = vmul.f32 %v3676_v40, %v1335_v29  ;;  %v1495_v40 = vand.u32 2147483647, %v1485_v37 }
 0x777   : > { %v1498_v54 = vor.u32 1.1754944e-38, %v1497_v51 }
 0x778   : > { %v1420_v27 = vmul.f32 %v2825_v19, %v1419_v25  ;;  %v1337_v46 = vpack.c.bf16 %v1336_v36, %v1336_v36  ;;  %vm1496_vm3 = vcmp.eq.f32.partialorder %v1495_v40, 8.507059e+37 }
 0x77a   : > { %v1421_v30 = vadd.f32 %v2825_v19, %v1420_v27 }
 0x77b   : > { %v2827_v32 = vpop.eup %2826 }
 0x77c   : > { %v1425_v38 = vsel %vm1424_vm13, %v2825_v19, %v1421_v30  ;;  %v1487_v39 = vmul.f32 %v2827_v32, %v1485_v37  ;;  %v1339_v41 = vpop.permute.xlu1 %1338  ;;  %vm1492_vm12 = vweird.f32 %v2827_v32 }
 0x77d   : > { %v1430_v43 = vsel %vm1427_vm0, %v1429_v35, %v1425_v38  ;;  %v1344_v44 = vsel %vm1128_vm9, %v1339_v41, 0  ;;  %vm1493_vm2 = vmor %vm1491_vm14, %vm1492_vm12  ;;  %vm1374_vm0 = vcmask 392192  }
 0x77e   : > { %v1431_v42 = vmul.f32 %v3680_v47, %v1430_v43  ;;  %v1488_v45 = vsub.f32 1.0, %v1487_v39  ;;  %1353 = vmatpush.bf16.msrb.mxu2 %v1344_v44  ;;  %v2651_v44 = vld [vmem:[%s3486_s0 + $0x18] sm:$0xff] }
 0x77f   : > { %1725 = vmatpush.bf16.msrb.mxu0 %v2651_v44  ;;  %v2652_v44 = vld [vmem:[%s3481_s3 + $0x4] sm:$0xf] }
 0x780   : > { %v1489_v48 = vmul.f32 %v2827_v32, %v1488_v45  ;;  %v1432_v49 = vpack.c.bf16 %v1431_v42, %v1431_v42  ;;  %v2650_v42 = vld [vmem:[%s3486_s0 + $0x10] sm:$0xff]  ;;  %v2648_v45 = vld [vmem:[%s3486_s0] sm:$0xff] }
 0x781   : > { %2490 = vmatmul.msk.bf16.vlgmr.msrb.gmra.mxu2 %vm1099_vm15, %v1337_v46 }
 0x782   : > { %v1490_v50 = vadd.f32 %v2827_v32, %v1489_v48  ;;  %2492 = vmatmul.msk.bf16.vlgmr.msrb.gmra.mxu1 %vm1099_vm15, %v1432_v49 }
 0x783   : > { %1726 = vmatpush.bf16.msrb.mxu0 %v2650_v42 }
 0x784   : > { %v1628_v52 = vpop.xlane.xlu2 %1627  ;;  %v1494_v53 = vsel %vm1493_vm2, %v2827_v32, %v1490_v50 }
 0x785   : > { %2828 = vrcp.f32 %v1628_v52  ;;  %v1499_v56 = vsel %vm1496_vm3, %v1498_v54, %v1494_v53  ;;  %v1640_v0 = vand.u32 2147483648, %v1628_v52  ;;  %vm1634_vm5 = vweird.f32 %v1628_v52 }
 0x786   : > { %v1500_v59 = vmul.f32 %v3684_v55, %v1499_v56  ;;  %v1638_v8 = vand.u32 2147483647, %v1628_v52 }
 0x787   : > { %v1646_v47 = vpop.permute.xlu0 %1645  ;;  %v1641_v10 = vor.u32 1.1754944e-38, %v1640_v0 }
 0x788   : > { %v1651_v3 = vsel %vm1128_vm9, %v1646_v47, 0  ;;  %v1501_v5 = vpack.c.bf16 %v1500_v59, %v1500_v59  ;;  %vm1639_vm7 = vcmp.eq.f32.partialorder %v1638_v8, 8.507059e+37 }
 0x789   : > { %v3713_v57 = vpop.f32.mrf.mxu1 }
 0x78b   : > { %v2829_v58 = vpop.eup %2828 }
 0x78c   : > { %v1630_v60 = vmul.f32 %v2829_v58, %v1628_v52  ;;  %v1504_v62 = vpop.permute.xlu2 %1503  ;;  %vm1635_vm4 = vweird.f32 %v2829_v58 }
 0x78d   : > { %v1509_v63 = vsel %vm1128_vm9, %v1504_v62, 0  ;;  %vm1636_vm6 = vmor %vm1634_vm5, %vm1635_vm4 }
 0x78e   : > { %v1631_v1 = vsub.f32 1.0, %v1630_v60  ;;  %1518 = vmatpush.bf16.msra.mxu2 %v1509_v63 }
 0x78f   : > { %v1575_v4 = vpop.permute.xlu0 %1574 }
 0x790   : > { %v1632_v6 = vmul.f32 %v2829_v58, %v1631_v1  ;;  %v1580_v7 = vsel %vm1128_vm9, %v1575_v4, 0  ;;  %v2844_v4 = vld [vmem:[#allocation2] sm:$0xff] }
 0x791   : > { %v1286_v13 = vpop.f32.mrf.mxu1  ;;  %2494 = vmatmul.msk.bf16.vlgmr.msra.gmra.mxu2 %vm1099_vm15, %v1501_v5  ;;  %1589 = vmatpush.bf16.msra.mxu1 %v1580_v7 }
 0x792   : > { %1660 = vmatpush.bf16.msrb.mxu2 %v1651_v3  ;;  %v1633_v55 = vadd.f32 %v2829_v58, %v1632_v6  ;;  %v2845_v13 = vld [vmem:[#allocation2 + $0x8] sm:$0xff] }
 0x794   : > { %v1637_v9 = vsel %vm1636_vm6, %v2829_v58, %v1633_v55 }
 0x795   : > { %v1642_v11 = vsel %vm1639_vm7, %v1641_v10, %v1637_v9 }
 0x796   : > { %v1643_v33 = vmul.f32 %v3696_v20, %v1642_v11 }
 0x798   : > { %v1644_v34 = vpack.c.bf16 %v1643_v33, %v1643_v33 }
 0x7a1   : > { %2498 = vmatmul.msk.bf16.vlgmr.msrb.gmra.mxu2 %vm1099_vm15, %v1644_v34 }
 0x7a7   : > { %v1557_v14 = vpop.xlane.xlu1 %1556 }
 0x7a8   : > { %2830 = vrcp.f32 %v1557_v14  ;;  %v1569_v18 = vand.u32 2147483648, %v1557_v14  ;;  %v1567_v21 = vand.u32 2147483647, %v1557_v14  ;;  %vm1563_vm8 = vweird.f32 %v1557_v14 }
 0x7aa   : > { %v1570_v37 = vor.u32 1.1754944e-38, %v1569_v18  ;;  %vm1568_vm13 = vcmp.eq.f32.partialorder %v1567_v21, 8.507059e+37  ;;  %v2542_v18 = vld [vmem:[%s3481_s3 + $0x30] sm:$0xf]  ;;  %v2658_v21 = vld [vmem:[%s3481_s3 + $0x34] sm:$0xf] }
 0x7ae   : > { %v2831_v15 = vpop.eup %2830 }
 0x7af   : > { %v1559_v16 = vmul.f32 %v2831_v15, %v1557_v14  ;;  %vm1564_vm9 = vweird.f32 %v2831_v15 }
 0x7b0   : > { %vm1565_vm11 = vmor %vm1563_vm8, %vm1564_vm9 }
 0x7b1   : > { %v1560_v31 = vsub.f32 1.0, %v1559_v16 }
 0x7b3   : > { %v1561_v19 = vmul.f32 %v2831_v15, %v1560_v31 }
 0x7b5   : > { %v1562_v22 = vadd.f32 %v2831_v15, %v1561_v19  ;;  %v2659_v19 = vld [vmem:[%s3481_s3 + $0x34] sm:$0xf0] }
 0x7b7   : > { %v1566_v24 = vsel %vm1565_vm11, %v2831_v15, %v1562_v22  ;;  %v2543_v22 = vor.u32 %v2659_v19, %v2542_v18  ;;  %v2672_v18 = vld [vmem:[%s3496_s19 + $0x60] sm:$0xff]  ;;  %v2662_v19 = vld [vmem:[%s3496_s19 + $0x10] sm:$0xff] }
 0x7b8   : > { %v1571_v17 = vsel %vm1568_vm13, %v1570_v37, %v1566_v24  ;;  %v2544_v37 = vld [vmem:[%s3481_s3 + $0x38] sm:$0xf0] }
 0x7b9   : > { %v1572_v20 = vmul.f32 %v3704_v23, %v1571_v17  ;;  %v2547_v24 = vor.u32 %v2658_v21, %v2544_v37  ;;  %1855 = vmatpush.bf16.msrb.mxu1 %v2543_v22  ;;  %v2534_v17 = vld [vmem:[%s3481_s3 + $0x20] sm:$0xf]  ;;  %v2671_v21 = vld [vmem:[%s3496_s19 + $0x58] sm:$0xff]  ;;  %v2661_v22 = vld [vmem:[%s3496_s19 + $0x8] sm:$0xff] }
 0x7ba   : > { %v1801_v37 = vld [vmem:[%s3491_s27] sm:$0x3] }
 0x7bb   : > { %v1573_v25 = vpack.c.bf16 %v1572_v20, %v1572_v20  ;;  %1869 = vmatpush.bf16.msra.mxu3 %v2547_v24  ;;  %v2657_v20 = vld [vmem:[%s3481_s3 + $0x24] sm:$0xf0]  ;;  %v2670_v24 = vld [vmem:[%s3496_s19 + $0x50] sm:$0xff] }
 0x7bd   : > { %2496 = vmatmul.msk.bf16.vlgmr.msra.gmra.mxu1 %vm1099_vm15, %v1573_v25  ;;  %vm1372_vm15 = vcmask 261120   ;;  %v2656_v25 = vld [vmem:[%s3481_s3 + $0x24] sm:$0xf] }
 0x7ff   : > { %v1448_v26 = vpop.f32.mrf.mxu1 }
 0x804   : > { %v1355_v27 = vpop.f32.mrf.mxu2 }
 0x807   : > { %v1450_v28 = vpop.f32.mrf.mxu1 }
 0x80c   : > { %v1357_v29 = vpop.f32.mrf.mxu2 }
 0x80d   : > { %v2526_v29 = vld [vmem:[%s3481_s3 + $0x10] sm:$0xf] }
 0x814   : > { %v1520_v30 = vpop.f32.mrf.mxu2 }
 0x815   : > { %v2778_v32 = vpack.i.bf16 %v1520_v30, %v3642_v61  ;;  %v2649_v61 = vld [vmem:[%s3486_s0 + $0x8] sm:$0xff]  ;;  %s3932_s0 = scalar_lea.vmem [#allocation9], %s3447_s1  ;;  %v2655_v30 = vld [vmem:[%s3481_s3 + $0x14] sm:$0xf0] }
 0x816   : > { %1727 = vmatpush.bf16.msrb.mxu0 %v2649_v61  ;;  %v2790_v63 = vld [vmem:[%s3932_s0] ss:$0 sm:$0xff]  ;;  %s3938_s0 = sld [smem:[#allocation35_spill]] (!%p2614_p7) }
 0x817   : > { %2779 = vrot.lane.b32.xlu0 %v2778_v32, %s3149_s21  ;;  %v2654_v32 = vld [vmem:[%s3481_s3 + $0x14] sm:$0xf] }
 0x81a   : > { %1728 = vmatpush.bf16.msrb.mxu0 %v2648_v45  ;;  %v2520_v45 = vld [vmem:[%s3481_s3 + $0x8] sm:$0xf0] }
 0x81c   : > { %v1522_v35 = vpop.f32.mrf.mxu2 }
 0x81d   : > { %v2527_v35 = vor.u32 %v2655_v30, %v2526_v29  ;;  %v1805_v30 = vperm.slane %v1801_v37, 1 }
 0x824   : > { %v1662_v36 = vpop.f32.mrf.mxu2 }
 0x825   : > { %v2783_v38 = vpack.i.bf16 %v1662_v36, %v1355_v27  ;;  %v2536_v27 = vld [vmem:[%s3481_s3 + $0x28] sm:$0xf0]  ;;  %v2528_v36 = vld [vmem:[%s3481_s3 + $0x18] sm:$0xf0] }
 0x826   : > { %v2539_v28 = vor.u32 %v2656_v25, %v2536_v27  ;;  %v2669_v25 = vld [vmem:[%s3496_s19 + $0x48] sm:$0xff] }
 0x827   : > { %2784 = vrot.lane.b32.xlu0 %v2783_v38, %s3145_s26 }
 0x828   : > { %1870 = vmatpush.bf16.msra.mxu3 %v2539_v28  ;;  %v2668_v28 = vld [vmem:[%s3496_s19 + $0x40] sm:$0xff] }
 0x82c   : > { %v1664_v23 = vpop.f32.mrf.mxu2 }
 0x82d   : > { %v2531_v23 = vor.u32 %v2654_v32, %v2528_v36 }
 0x82f   : > { %1871 = vmatpush.bf16.msra.mxu3 %v2531_v23 }
 0x83a   : > { %v1591_v39 = vpop.f32.mrf.mxu1 }
 0x83b   : > { %v2773_v41 = vpack.i.bf16 %v1591_v39, %v3713_v57 }
 0x83d   : > { %2774 = vrot.lane.b32.xlu2 %v2773_v41, %s3152_s9  ;;  %v2518_v41 = vld [vmem:[%s3481_s3] sm:$0xf] }
 0x842   : > { %v1593_v43 = vpop.f32.mrf.mxu1 }
 0x843   : > { %v2653_v43 = vld [vmem:[%s3481_s3 + $0x4] sm:$0xf0]  ;;  %s3933_s3 = scalar_lea.vmem [#allocation11], %s3447_s1 }
 0x844   : > { %v2519_v61 = vor.u32 %v2653_v43, %v2518_v41 }
 0x889   : > { %v2780_v46 = vpop.permute.xlu0 %2779 }
 0x88a   : > { %v2782_v48 = vunpack.i.h.bf16 %v2780_v46  ;;  %v2781_v49 = vunpack.i.l.bf16 %v2780_v46  ;;  %v2523_v46 = vor.u32 %v2652_v44, %v2520_v45 }
 0x88c   : > { %v1678_v52 = vsel %vm1077_vm10, %v1448_v26, %v2782_v48  ;;  %v1371_v53 = vsel %vm1077_vm10, %v3610_v2, %v2781_v49  ;;  %v2535_v26 = vor.u32 %v2657_v20, %v2534_v17  ;;  %1872 = vmatpush.bf16.msra.mxu3 %v2523_v46  ;;  %v2660_v17 = vld [vmem:[%s3496_s19] sm:$0xff]  ;;  %v1804_v20 = vperm.slane %v1801_v37, 0 }
 0x88e   : > { %1856 = vmatpush.bf16.msrb.mxu1 %v2535_v26 }
 0x892   : > { %1857 = vmatpush.bf16.msrb.mxu1 %v2527_v35 }
 0x896   : > { %1858 = vmatpush.bf16.msrb.mxu1 %v2519_v61 }
 0x897   : > { %v2775_v50 = vpop.permute.xlu2 %2774 }
 0x898   : > { %v2777_v51 = vunpack.i.h.bf16 %v2775_v50  ;;  %v2776_v40 = vunpack.i.l.bf16 %v2775_v50 }
 0x899   : > { %v2785_v54 = vpop.permute.xlu0 %2784 }
 0x89a   : > { %v1373_v47 = vsel %vm1372_vm15, %v1371_v53, %v2776_v40  ;;  %v1679_v56 = vsel %vm1372_vm15, %v1678_v52, %v2777_v51  ;;  %v2787_v57 = vunpack.i.h.bf16 %v2785_v54  ;;  %v2786_v58 = vunpack.i.l.bf16 %v2785_v54 }
 0x89c   : > { %v1680_v59 = vsel %vm1374_vm0, %v1679_v56, %v2787_v57  ;;  %v1375_v60 = vsel %vm1374_vm0, %v1373_v47, %v2786_v58 }
 0x89d   : > { %v1690_v62 = vpack.c.bf16 %v1680_v59, %v1375_v60 }
 0x89f   : > { %2515 = vmatmul.msk.bf16.vlgmr.msrb.gmra.mxu0 %vm913_vm1, %v1690_v62 }
 0x91c   : > { %v1730_v1 = vpop.f32.mrf.mxu0 }
 0x91d   : > { %v1731_v3 = vadd.f32 %v2790_v63, %v1730_v1 }
 0x91f   : > { %v3739_v5 = vadd.f32 %v2844_v4, %v1731_v3 }
 0x921   : > { %v1739_v2 = vsel %vm913_vm1, %v3739_v5, 0.0 }
 0x922   : > { %1740 = vadd.xlane.f32.xlu2 %v1739_v2  ;;  %v2792_v2 = vld [vmem:[%s3934_s22] ss:$0 sm:$0xff] }
 0x924   : > { %v1732_v6 = vpop.f32.mrf.mxu0 }
 0x925   : > { %v1733_v7 = vadd.f32 %v2790_v63, %v1732_v6  ;;  %v2791_v63 = vld [vmem:[%s3933_s3] ss:$0 sm:$0xff]  ;;  %s3939_s3 = smov (!%p2614_p7), %s3938_s0 }
 0x927   : > { %v3743_v55 = vadd.f32 %v2845_v13, %v1733_v7 }
 0x929   : > { %v1742_v0 = vsel %vm913_vm1, %v3743_v55, 0.0 }
 0x92a   : > { %1743 = vadd.xlane.f32.xlu0 %v1742_v0 }
 0x995   : > { %v1741_v8 = vpop.xlane.xlu2 %1740 }
 0x996   : > { %v1745_v9 = vmul.f32 %v1741_v8, %v3509_v12 }
 0x998   : > { %v3749_v10 = vsub.f32 %v3739_v5, %v1745_v9 }
 0x99a   : > { %v1749_v11 = vmul.f32 %v3749_v10, %v3749_v10 }
 0x99c   : > { %v1751_v33 = vsel %vm913_vm1, %v1749_v11, 0.0  ;;  %v2666_v11 = vld [vmem:[%s3496_s19 + $0x30] sm:$0xff] }
 0x99d   : > { %v1744_v34 = vpop.xlane.xlu0 %1743  ;;  %1752 = vadd.xlane.f32.xlu1 %v1751_v33  ;;  %v2675_v33 = vld [vmem:[%s3496_s19 + $0x78] sm:$0xff] }
 0x99e   : > { %v1746_v14 = vmul.f32 %v1744_v34, %v3509_v12  ;;  %2063 = vmatpush.bf16.msra.mxu0 %v2675_v33  ;;  %v2665_v34 = vld [vmem:[%s3496_s19 + $0x28] sm:$0xff] }
 0x9a0   : > { %v3756_v15 = vsub.f32 %v3743_v55, %v1746_v14  ;;  %v2674_v14 = vld [vmem:[%s3496_s19 + $0x70] sm:$0xff] }
 0x9a2   : > { %v1750_v16 = vmul.f32 %v3756_v15, %v3756_v15  ;;  %2064 = vmatpush.bf16.msra.mxu0 %v2674_v14  ;;  %v2793_v14 = vld [vmem:[%s773_s4] ss:$0 sm:$0xff] }
 0x9a4   : > { %v1754_v31 = vsel %vm913_vm1, %v1750_v16, 0.0  ;;  %v2673_v16 = vld [vmem:[%s3496_s19 + $0x68] sm:$0xff] }
 0x9a5   : > { %1755 = vadd.xlane.f32.xlu1 %v1754_v31  ;;  %v2663_v31 = vld [vmem:[%s3496_s19 + $0x18] sm:$0xff] }
 0x9a6   : > { %2065 = vmatpush.bf16.msra.mxu0 %v2673_v16 }
 0x9aa   : > { %2066 = vmatpush.bf16.msra.mxu0 %v2672_v18 }
 0x9ae   : > { %2067 = vmatpush.bf16.msra.mxu0 %v2671_v21 }
 0x9b2   : > { %2068 = vmatpush.bf16.msra.mxu0 %v2670_v24 }
 0x9b6   : > { %2069 = vmatpush.bf16.msra.mxu0 %v2669_v25 }
 0x9ba   : > { %2070 = vmatpush.bf16.msra.mxu0 %v2668_v28 }
 0xa10   : > { %v1753_v38 = vpop.xlane.xlu1 %1752 }
 0xa11   : > { %v1757_v39 = vmul.f32 %v1753_v38, %v3509_v12 }
 0xa13   : > { %v1759_v42 = vadd.f32 1e-05, %v1757_v39 }
 0xa15   : > { %2832 = vrsqrt.f32 %v1759_v42  ;;  %vm1767_vm12 = vweird.f32 %v1759_v42 }
 0xa18   : > { %v1756_v48 = vpop.xlane.xlu1 %1755 }
 0xa19   : > { %v1758_v49 = vmul.f32 %v1756_v48, %v3509_v12 }
 0xa1b   : > { %v2833_v50 = vpop.eup %2832  ;;  %v1760_v51 = vadd.f32 1e-05, %v1758_v49 }
 0xa1c   : > { %v1762_v40 = vmul.f32 %v2833_v50, %v1759_v42  ;;  %vm1768_vm10 = vweird.f32 %v2833_v50 }
 0xa1d   : > { %2834 = vrsqrt.f32 %v1760_v51  ;;  %vm1769_vm14 = vmor %vm1767_vm12, %vm1768_vm10  ;;  %vm1777_vm3 = vweird.f32 %v1760_v51 }
 0xa1e   : > { %v1763_v52 = vmul.f32 %v2833_v50, %v1762_v40 }
 0xa20   : > { %v1764_v53 = vmul.f32 0.5, %v1763_v52 }
 0xa22   : > { %v1765_v54 = vsub.f32 1.5, %v1764_v53 }
 0xa23   : > { %v2835_v47 = vpop.eup %2834 }
 0xa24   : > { %v1766_v56 = vmul.f32 %v2833_v50, %v1765_v54  ;;  %v1772_v57 = vmul.f32 %v2835_v47, %v1760_v51  ;;  %vm1778_vm2 = vweird.f32 %v2835_v47 }
 0xa25   : > { %vm1779_vm4 = vmor %vm1777_vm3, %vm1778_vm2 }
 0xa26   : > { %v1773_v58 = vmul.f32 %v2835_v47, %v1772_v57  ;;  %v1770_v59 = vsel %vm1769_vm14, %v2833_v50, %v1766_v56 }
 0xa27   : > { %v1781_v1 = vmul.f32 %v1770_v59, %v3749_v10  ;;  %v2667_v10 = vld [vmem:[%s3496_s19 + $0x38] sm:$0xff] }
 0xa28   : > { %v1774_v60 = vmul.f32 0.5, %v1773_v58  ;;  %2049 = vmatpush.bf16.msra.mxu2 %v2667_v10 }
 0xa29   : > { %v1786_v6 = vmul.f32 %v2791_v63, %v1781_v1 }
 0xa2a   : > { %v1775_v62 = vsub.f32 1.5, %v1774_v60 }
 0xa2b   : > { %v1791_v0 = vadd.f32 %v2792_v2, %v1786_v6 }
 0xa2c   : > { %v1776_v3 = vmul.f32 %v2835_v47, %v1775_v62  ;;  %2050 = vmatpush.bf16.msra.mxu2 %v2666_v11 }
 0xa2e   : > { %v1780_v4 = vsel %vm1779_vm4, %v2835_v47, %v1776_v3 }
 0xa2f   : > { %v1782_v7 = vmul.f32 %v1780_v4, %v3756_v15  ;;  %v2664_v15 = vld [vmem:[%s3496_s19 + $0x20] sm:$0xff]  ;;  %s3935_s19 = sld [smem:[#allocation33_spill]] (!%p2614_p7) }
 0xa30   : > { %2051 = vmatpush.bf16.msra.mxu2 %v2665_v34 }
 0xa31   : > { %v1787_v13 = vmul.f32 %v2791_v63, %v1782_v7 }
 0xa33   : > { %v1792_v8 = vadd.f32 %v2792_v2, %v1787_v13 }
 0xa34   : > { %2052 = vmatpush.bf16.msra.mxu2 %v2664_v15 }
 0xa35   : > { %v1802_v9 = vpack.c.bf16 %v1792_v8, %v1791_v0 }
 0xa37   : > { %2548 = vmatmul.msk.bf16.vlgmr.msrb.gmra.mxu1 %vm913_vm1, %v1802_v9  ;;  %2549 = vmatmul.msk.bf16.vlgmr.msra.gmra.mxu3 %vm913_vm1, %v1802_v9 }
 0xa38   : > { %2053 = vmatpush.bf16.msra.mxu2 %v2663_v31 }
 0xa3c   : > { %2054 = vmatpush.bf16.msra.mxu2 %v2662_v19 }
 0xa40   : > { %2055 = vmatpush.bf16.msra.mxu2 %v2661_v22 }
 0xa44   : > { %2056 = vmatpush.bf16.msra.mxu2 %v2660_v17 }
 0xab4   : > { %v1860_v26 = vpop.f32.mrf.mxu1 }
 0xab5   : > { %v1861_v27 = vadd.f32 %v1860_v26, %v1804_v20 }
 0xab7   : > { %v1883_v29 = vmul.f32 0.044715, %v1861_v27  ;;  %v1879_v63 = vmul.f32 0.5, %v1861_v27 }
 0xab9   : > { %v1887_v32 = vmul.f32 %v1883_v29, %v1861_v27 }
 0xaba   : > { %v1874_v35 = vpop.f32.mrf.mxu3 }
 0xabb   : > { %v1891_v36 = vmul.f32 %v1887_v32, %v1861_v27  ;;  %v1875_v38 = vadd.f32 %v1874_v35, %v1805_v30 }
 0xabc   : > { %v1862_v23 = vpop.f32.mrf.mxu1 }
 0xabd   : > { %v1895_v39 = vadd.f32 %v1891_v36, %v1861_v27  ;;  %v1884_v41 = vmul.f32 0.044715, %v1875_v38  ;;  %v1863_v43 = vadd.f32 %v1862_v23, %v1804_v20  ;;  %v1880_v8 = vmul.f32 0.5, %v1875_v38 }
 0xabf   : > { %v1888_v44 = vmul.f32 %v1884_v41, %v1875_v38  ;;  %v1885_v42 = vmul.f32 0.044715, %v1863_v43  ;;  %v1899_v61 = vmul.f32 0.7978846, %v1895_v39  ;;  %v1881_v1 = vmul.f32 0.5, %v1863_v43 }
 0xac1   : > { %v1892_v45 = vmul.f32 %v1888_v44, %v1875_v38  ;;  %v1889_v46 = vmul.f32 %v1885_v42, %v1863_v43  ;;  %2836 = vtanh.f32 %v1899_v61 }
 0xac2   : > { %v1876_v48 = vpop.f32.mrf.mxu3 }
 0xac3   : > { %v1896_v49 = vadd.f32 %v1892_v45, %v1875_v38  ;;  %v1893_v50 = vmul.f32 %v1889_v46, %v1863_v43  ;;  %v1877_v51 = vadd.f32 %v1876_v48, %v1805_v30 }
 0xac5   : > { %v1897_v40 = vadd.f32 %v1893_v50, %v1863_v43  ;;  %v1886_v52 = vmul.f32 0.044715, %v1877_v51  ;;  %v1900_v53 = vmul.f32 0.7978846, %v1896_v49  ;;  %v1882_v9 = vmul.f32 0.5, %v1877_v51 }
 0xac7   : > { %v1901_v54 = vmul.f32 0.7978846, %v1897_v40  ;;  %v1890_v47 = vmul.f32 %v1886_v52, %v1877_v51  ;;  %v2837_v57 = vpop.eup %2836 }
 0xac8   : > { %v1907_v60 = vadd.f32 1.0, %v2837_v57 }
 0xac9   : > { %v1894_v56 = vmul.f32 %v1890_v47, %v1877_v51  ;;  %2838 = vtanh.f32 %v1901_v54 }
 0xaca   : > { %2840 = vtanh.f32 %v1900_v53  ;;  %v1911_v2 = vmul.f32 %v1907_v60, %v1879_v63 }
 0xacb   : > { %v1898_v58 = vadd.f32 %v1894_v56, %v1877_v51 }
 0xacd   : > { %v1902_v59 = vmul.f32 0.7978846, %v1898_v58 }
 0xacf   : > { %v2839_v62 = vpop.eup %2838  ;;  %2842 = vtanh.f32 %v1902_v59 }
 0xad0   : > { %v1909_v3 = vadd.f32 1.0, %v2839_v62  ;;  %v2841_v4 = vpop.eup %2840 }
 0xad1   : > { %v1908_v13 = vadd.f32 1.0, %v2841_v4 }
 0xad2   : > { %v1913_v6 = vmul.f32 %v1909_v3, %v1881_v1 }
 0xad3   : > { %v1912_v11 = vmul.f32 %v1908_v13, %v1880_v8 }
 0xad4   : > { %v1948_v7 = vpack.c.bf16 %v1913_v6, %v1911_v2 }
 0xad5   : > { %v2843_v0 = vpop.eup %2842 }
 0xad6   : > { %2057 = vmatmul.bf16.vlgmr.msra.gmra.mxu2 %v1948_v7  ;;  %v1910_v10 = vadd.f32 1.0, %v2843_v0 }
 0xad8   : > { %v1914_v33 = vmul.f32 %v1910_v10, %v1882_v9 }
 0xada   : > { %v1949_v34 = vpack.c.bf16 %v1914_v33, %v1912_v11 }
 0xadc   : > { %2071 = vmatmul.bf16.vlgmr.msra.gmra.mxu0 %v1949_v34 }
 0xb59   : > { %v2058_v15 = vpop.f32.mrf.mxu2  ;;  %v2072_v16 = vpop.f32.mrf.mxu0 }
 0xb5a   : > { %v2059_v31 = vadd.f32 %v2793_v14, %v2058_v15 }
 0xb5c   : > { %v2073_v18 = vadd.f32 %v2072_v16, %v2059_v31 }
 0xb5e   : > { %v2077_v19 = vadd.f32 %v2073_v18, %v3739_v5 }
 0xb60   : > { %2079 = vst.msk [vmem:[#allocation2] sm:$0xff] %vm913_vm1, %v2077_v19 }
 0xb61   : > { %v2060_v21 = vpop.f32.mrf.mxu2  ;;  %v2074_v37 = vpop.f32.mrf.mxu0 }
 0xb62   : > { %v2061_v22 = vadd.f32 %v2793_v14, %v2060_v21 }
 0xb64   : > { %v2075_v24 = vadd.f32 %v2074_v37, %v2061_v22  ;;  %2084 = sbr.rel (%p2614_p7) target bundleno = 3339 (0xd0b), region = 132 }
 0xb66   : > { %v2078_v17 = vadd.f32 %v2075_v24, %v3743_v55 }
 0xb68   : > { %2080 = vst.msk [vmem:[#allocation2 + $0x8] sm:$0xff] %vm913_vm1, %v2078_v17 }
 0xb69   : > { %v2087_v20 = vsel %vm913_vm1, %v2077_v19, 0.0  ;;  %v2090_v25 = vsel %vm913_vm1, %v2078_v17, 0.0  ;;  %v2679_v38 = vld [vmem:[%s3935_s19 + $0x18] sm:$0xff]  ;;  %v2678_v23 = vld [vmem:[%s3935_s19 + $0x10] sm:$0xff]  ;;  %v2677_v39 = vld [vmem:[%s3935_s19 + $0x8] sm:$0xff] }
 0xb6a   : > { %2088 = vadd.xlane.f32.xlu0 %v2087_v20  ;;  %2193 = vmatpush.bf16.msra.mxu0 %v2679_v38  ;;  %v2676_v42 = vld [vmem:[%s3935_s19] sm:$0xff]  ;;  %v2142_v7 = vld [vmem:[%s3939_s3 + $0x8] sm:$0xff] }
 0xb6b   : > { %v2847_v62 = vld [vmem:[%s3937_s20] ss:$0 sm:$0xff]  ;;  %vm2144_vm15 = vcmp.ge.f32.partialorder %v2142_v7, 0.3 }
 0xb6c   : > { %v2141_v6 = vld [vmem:[%s3938_s0] sm:$0xff] }
 0xb6d   : > { %vm2143_vm13 = vcmp.ge.f32.partialorder %v2141_v6, 0.3  ;;  %v2848_v33 = vld [vmem:[%s3940_s14] ss:$0 sm:$0xff] }
 0xb6e   : > { %2194 = vmatpush.bf16.msra.mxu0 %v2678_v23 }
 0xb72   : > { %2091 = vadd.xlane.f32.xlu0 %v2090_v25  ;;  %2195 = vmatpush.bf16.msra.mxu0 %v2677_v39 }
 0xb76   : > { %2196 = vmatpush.bf16.msra.mxu0 %v2676_v42 }
 0xbdd   : > { %v2089_v5 = vpop.xlane.xlu0 %2088 }
 0xbde   : > { %v2093_v26 = vmul.f32 %v2089_v5, %v3509_v12 }
 0xbe0   : > { %v2095_v27 = vsub.f32 %v2077_v19, %v2093_v26 }
 0xbe2   : > { %v2097_v28 = vmul.f32 %v2095_v27, %v2095_v27 }
 0xbe4   : > { %v2099_v29 = vsel %vm913_vm1, %v2097_v28, 0.0 }
 0xbe5   : > { %2100 = vadd.xlane.f32.xlu1 %v2099_v29  ;;  %v2092_v55 = vpop.xlane.xlu0 %2091 }
 0xbe6   : > { %v2094_v30 = vmul.f32 %v2092_v55, %v3509_v12 }
 0xbe8   : > { %v2096_v32 = vsub.f32 %v2078_v17, %v2094_v30 }
 0xbea   : > { %v2098_v35 = vmul.f32 %v2096_v32, %v2096_v32 }
 0xbec   : > { %v2102_v36 = vsel %vm913_vm1, %v2098_v35, 0.0 }
 0xbed   : > { %2103 = vadd.xlane.f32.xlu1 %v2102_v36 }
 0xc58   : > { %v2101_v41 = vpop.xlane.xlu1 %2100 }
 0xc59   : > { %v2105_v43 = vmul.f32 %v2101_v41, %v3509_v12 }
 0xc5b   : > { %v2107_v44 = vadd.f32 1e-05, %v2105_v43 }
 0xc5d   : > { %2849 = vrsqrt.f32 %v2107_v44  ;;  %vm2115_vm6 = vweird.f32 %v2107_v44 }
 0xc60   : > { %v2104_v61 = vpop.xlane.xlu1 %2103 }
 0xc61   : > { %v2106_v45 = vmul.f32 %v2104_v61, %v3509_v12  ;;  %v2846_v12 = vld [vmem:[%s3936_s15] ss:$0 sm:$0xff] }
 0xc63   : > { %v2850_v46 = vpop.eup %2849  ;;  %v2108_v48 = vadd.f32 1e-05, %v2106_v45 }
 0xc64   : > { %v2110_v49 = vmul.f32 %v2850_v46, %v2107_v44  ;;  %vm2116_vm5 = vweird.f32 %v2850_v46 }
 0xc65   : > { %2851 = vrsqrt.f32 %v2108_v48  ;;  %vm2117_vm7 = vmor %vm2115_vm6, %vm2116_vm5  ;;  %vm2125_vm8 = vweird.f32 %v2108_v48 }
 0xc66   : > { %v2111_v50 = vmul.f32 %v2850_v46, %v2110_v49 }
 0xc68   : > { %v2112_v51 = vmul.f32 0.5, %v2111_v50 }
 0xc6a   : > { %v2113_v40 = vsub.f32 1.5, %v2112_v51 }
 0xc6b   : > { %v2852_v52 = vpop.eup %2851 }
 0xc6c   : > { %v2114_v53 = vmul.f32 %v2850_v46, %v2113_v40  ;;  %v2120_v54 = vmul.f32 %v2852_v52, %v2108_v48  ;;  %vm2126_vm9 = vweird.f32 %v2852_v52 }
 0xc6d   : > { %vm2127_vm11 = vmor %vm2125_vm8, %vm2126_vm9 }
 0xc6e   : > { %v2118_v47 = vsel %vm2117_vm7, %v2850_v46, %v2114_v53  ;;  %v2121_v56 = vmul.f32 %v2852_v52, %v2120_v54 }
 0xc6f   : > { %v2129_v57 = vmul.f32 %v2118_v47, %v2095_v27 }
 0xc70   : > { %v2122_v58 = vmul.f32 0.5, %v2121_v56 }
 0xc71   : > { %v2134_v60 = vmul.f32 %v2846_v12, %v2129_v57 }
 0xc72   : > { %v2123_v59 = vsub.f32 1.5, %v2122_v58 }
 0xc73   : > { %v2139_v4 = vadd.f32 %v2847_v62, %v2134_v60 }
 0xc74   : > { %v2124_v63 = vmul.f32 %v2852_v52, %v2123_v59 }
 0xc75   : > { %v2145_v0 = vmul.f32 1.4285715, %v2139_v4 }
 0xc76   : > { %v2128_v1 = vsel %vm2127_vm11, %v2852_v52, %v2124_v63 }
 0xc77   : > { %v2130_v3 = vmul.f32 %v2128_v1, %v2096_v32  ;;  %v2147_v9 = vsel %vm2143_vm13, %v2145_v0, 0.0 }
 0xc79   : > { %v2135_v2 = vmul.f32 %v2846_v12, %v2130_v3 }
 0xc7b   : > { %v2140_v13 = vadd.f32 %v2847_v62, %v2135_v2 }
 0xc7d   : > { %v2146_v8 = vmul.f32 1.4285715, %v2140_v13 }
 0xc7f   : > { %v2148_v10 = vsel %vm2144_vm15, %v2146_v8, 0.0 }
 0xc80   : > { %v2158_v11 = vpack.c.bf16 %v2148_v10, %v2147_v9 }
 0xc82   : > { %2631 = vmatmul.msk.bf16.vlgmr.msra.gmra.mxu0 %vm913_vm1, %v2158_v11 }
 0xcff   : > { %v2198_v34 = vpop.f32.mrf.mxu0 }
 0xd00   : > { %v2199_v14 = vadd.f32 %v2848_v33, %v2198_v34 }
 0xd02   : > { %2203 = vst [vmem:[#allocation15] sm:$0xff] %v2199_v14 }
 0xd07   : > { %v2200_v15 = vpop.f32.mrf.mxu0 }
 0xd08   : > { %v2201_v16 = vadd.f32 %v2848_v33, %v2200_v15 }
 0xd0a   : > { %2204 = vst [vmem:[#allocation15 + $0x8] sm:$0xff] %v2201_v16 }
 0xd0b PF: > { %p2726_p2 = scmp.eq.s32.totalorder %s3363_s18, 1  ;;  %s3153_s29 = smov [#allocation15]  }
 0xd0c   : > { %s2210_s25 = sshll.u32 %s3153_s29, 4  ;;  %s3941_s7 = sld [smem:[#allocation36_spill]]  ;;  %s2211_s25 = int_to_ptr.vmem [resolvable:$true] %s2210_s25 }
 0xd0d   : > { %s3154_s15 = smov 128   ;;  %s3155_s16 = smov 8  }
 0xd12   : > { %s2212_s26 = sshll.u32 %s3941_s7, 4  ;;  %s2213_s26 = int_to_ptr.hbm [resolvable:$true] %s2212_s26 }
 0xd13   : > { %2697 = dma.vmem_to_hbm [thread:$0]  (%p2726_p2), %s2211_s25, 256, %s2213_s26, [#allocation5], %s3154_s15, %s3154_s15, %s3155_s16  }
 0xd14   : > { %3124 = dma.done.wait (%p2726_p2), [#allocation5], 256  }
 0xd15   : > { %3126 = vsyncadd (%p2726_p2), [#allocation5], 4294967040 }
 0xd16 PF: > { %s3942_s21 = sld [smem:[#allocation22_spill]]  ;;  %s3945_s0 = smov %s3133_s30 }
 0xd17   : > { %s3943_s20 = sld [smem:[#allocation21_spill]] }
 0xd18   : > { %s3944_s28 = sld [smem:[#allocation23_spill]] }
 0xd1c   : > { %p37_p8 = scmp.ge.s32.totalorder %s3942_s21, 4  }
 0xd1d   : > { %s3946_s30 = smov %s3943_s20 }
 0xd1e   : > { %s3947_s20 = smov %s3944_s28  ;;  %39 = sbr.rel (!%p37_p8) target bundleno = 23 (0x17), region = 223 }
 0xd23   :  { %2229 = vsyncpa [#allocation4], 1 }
 0xd24   :  { %2231 = vsyncpa [#allocation4 + $0x1], 1 }
 0xd25   :  { %2232 = vsyncpa [#allocation7], 1 }
 0xd26   :  { %2234 = vsyncpa [#allocation7 + $0x1], 1 }
 0xd27   :  { %2235 = vsyncpa [#allocation10], 1 }
 0xd28   :  { %2237 = vsyncpa [#allocation10 + $0x1], 1 }
 0xd29   :  { %2238 = vsyncpa [#allocation13], 1 }
 0xd2a   :  { %2240 = vsyncpa [#allocation13 + $0x1], 1 }
 0xd2b   :  { %2241 = vsyncpa [#allocation5], 1 }
 0xd2c   :  { %2243 = vsyncpa [#allocation5 + $0x1], 1 }

</bundles_post_ra>
